<compile_context>
chip_gen: v5e
topology: v5e:2x2
jax: 0.10.0
libtpu: 0.0.40
codegen_flags: <defaults>
</compile_context>

<pallas_src>
import jax
import jax.numpy as jnp
import numpy as np
from jax import lax
from jax.experimental import pallas as pl
from jax.experimental.pallas import tpu as pltpu

# ---------------------------------------------------------------------------
# Static linkage structure (replaces genF_Random / setupCoo).
# ---------------------------------------------------------------------------
NL1, NL2 = 3, 1
NPTS = 8                       # F0.shape[0] + nl2  ->  F0 has 7 rows
# PARENTS[i] = the two point indices column (i - nl1) of F0 marks with ones.
PARENTS = {3: (1, 2), 4: (0, 3), 5: (3, 4), 6: (2, 5), 7: (4, 6)}
EPS2 = 1e-4
N_LINKS = NPTS - NL1           # 5 FindC links
NPAR = 6 + 5 * N_LINKS         # per-batch scalar parameter count

# lds parameter, shape (NPTS - 1, 2) = (7, 2)  (deterministic "setupCoo")
LDS_NP = np.array(
    [
        [6.0, 0.0],    # point 1 position
        [2.0, 0.0],    # crank length for point 2 (second entry unused)
        [6.0, 6.0],    # point 3: l1 from parent A, l2 from parent B
        [5.0, 5.0],    # point 4
        [5.0, -5.0],   # point 5 (negative l2 -> mirrored branch)
        [6.0, 6.0],    # point 6
        [6.0, -6.0],   # point 7
    ],
    dtype=np.float32,
)


# ---------------------------------------------------------------------------
# Pallas kernel
# ---------------------------------------------------------------------------
def _findc(ax, ay, bx, by, sum_sq, dif_sq, dl12, d, abs_sum):
    """FindC_torch on (8, Na/8) coordinate tiles.

    sum_sq = (l1+l2)^2, dif_sq = (l1-l2)^2, dl12 = l1^2-l2^2, d = sign(l2),
    abs_sum = |l1|+|l2| are precomputed scalar constants (SMEM).
    """
    dx = bx - ax
    dy = by - ay
    s2 = dx * dx + dy * dy
    T2 = (sum_sq - s2) * (s2 - dif_sq)
    rs = jnp.sqrt(s2)
    base = (rs + abs_sum) * (1.0 / 3.0)
    b2 = base * base
    scale = b2 * b2
    # check kept in exact arithmetic: it gates the validity mask at eps2.
    check = T2 * 0.25 * pl.reciprocal(scale, approx=False)
    valid = check >= EPS2
    safe_s2 = jnp.where(s2 > 0.0, s2, 1.0)
    inv_2s2 = 0.5 * pl.reciprocal(safe_s2, approx=False)   # shared by T and Ut
    T = jnp.where(valid, jnp.sqrt(jnp.maximum(T2, 0.0)) * inv_2s2, 0.0)
    Ut = jnp.where(valid, dl12 * inv_2s2, 0.0)
    err = jnp.where(valid, 0.0, EPS2 - check)
    zx = (ax + bx) * 0.5 + dx * Ut - dy * T * d
    zy = (ay + by) * 0.5 + dy * Ut + dx * T * d
    return zx, zy, err


def nnb_kernel(par_ref, ang_ref, out_ref):
    # par_ref (SMEM): (B, NPAR) float32 per-batch scalar table:
    #   [phase, cos(theta), sin(theta), p1x, p1y, crank,
    #    then per link: (l1+l2)^2, (l1-l2)^2, l1^2-l2^2, sign(l2), |l1|+|l2|]
    # ang_ref (VMEM): (8, Na/8) shared angle tile.
    # out_ref (VMEM): (1, 24, Na/8): x2 rows 0:8, y2 rows 8:16, err rows 16:24.
    b = pl.program_id(0)
    phase = par_ref[b, 0]
    ct = par_ref[b, 1]
    st = par_ref[b, 2]
    p1x = par_ref[b, 3]
    p1y = par_ref[b, 4]
    crank = par_ref[b, 5]

    ang = ang_ref[...] + phase                    # (8, Na/8)

    # joints_last: points 0 and 1 are constant (scalars); the chain over the
    # static connectivity F is unrolled.
    px = [0.0, p1x, crank * jnp.cos(ang)]
    py = [0.0, p1y, crank * jnp.sin(ang)]
    err = jnp.zeros_like(ang)
    for k, i in enumerate(range(NL1, NPTS)):
        pa, pb = PARENTS[i]
        o = 6 + 5 * k
        zx, zy, e = _findc(px[pa], py[pa], px[pb], py[pb],
                           par_ref[b, o + 0], par_ref[b, o + 1],
                           par_ref[b, o + 2], par_ref[b, o + 3],
                           par_ref[b, o + 4])
        px.append(zx)
        py.append(zy)
        err = err + e

    x0 = px[NPTS - 1]
    y0 = py[NPTS - 1]

    # rotation by theta (cos/sin precomputed host-side)
    x = x0 * ct + y0 * st
    y = -x0 * st + y0 * ct

    # center + RMS-radius normalization (global reduction over all Na angles;
    # rsqrt + multiplies instead of sqrt + divides)
    x1 = x - jnp.mean(x)
    y1 = y - jnp.mean(y)
    msq = jnp.mean(x1 * x1 + y1 * y1)
    inv_std = lax.rsqrt(msq)
    std = msq * inv_std                           # == sqrt(msq)
    std1 = jnp.where(std < 0.1, 1.0 / (std + 0.01), 0.0)

    out_ref[0, 0:8, :] = x1 * inv_std
    out_ref[0, 8:16, :] = y1 * inv_std
    out_ref[0, 16:24, :] = err + std1


# ---------------------------------------------------------------------------
# Host-side wrapper
# ---------------------------------------------------------------------------
def _build_params(phase, theta, lds):
    """Precompute the per-batch scalar table (shape (NPAR,), float32)."""
    lds = jnp.asarray(lds, jnp.float32)
    l1 = lds[2:, 0]
    l2 = lds[2:, 1]
    head = jnp.stack([phase, jnp.cos(theta), jnp.sin(theta),
                      lds[0, 0], lds[0, 1], lds[1, 0]])
    per_link = jnp.stack(
        [(l1 + l2) ** 2,
         (l1 - l2) ** 2,
         l1 * l1 - l2 * l2,
         jnp.sign(l2),
         jnp.abs(l1) + jnp.abs(l2)],
        axis=1,
    ).reshape(-1)
    return jnp.concatenate([head, per_link]).astype(jnp.float32)


def nnb_forward(ang, phases, thetas, lds_batch):
    """Batched forward.

    ang:       (Na,) float32 angles, shared across the batch (Na % 8 == 0;
               Na a multiple of 1024 keeps stores lane-dense).
    phases:    (B,) scalar phase parameters.
    thetas:    (B,) scalar rotation parameters.
    lds_batch: (B, NPTS-1, 2) link-length parameters.
    Returns (x2, y2, err) each of shape (B, Na).
    """
    ang = jnp.asarray(ang, jnp.float32)
    na = ang.shape[0]
    assert na % 8 == 0, "Na must be a multiple of 8 for sublane packing"
    na8 = na // 8
    ang2d = ang.reshape(8, na8)

    params = jax.vmap(_build_params)(
        jnp.asarray(phases, jnp.float32),
        jnp.asarray(thetas, jnp.float32),
        jnp.asarray(lds_batch, jnp.float32),
    )                                             # (B, NPAR)
    B = params.shape[0]

    out = pl.pallas_call(
        nnb_kernel,
        out_shape=jax.ShapeDtypeStruct((B, 24, na8), jnp.float32),
        grid_spec=pltpu.PrefetchScalarGridSpec(
            num_scalar_prefetch=0,
            grid=(B,),
            in_specs=[
                # parameter table: whole array resident in SMEM
                pl.BlockSpec(memory_space=pltpu.MemorySpace.SMEM),
                # shared angle tile, same block every grid step
                pl.BlockSpec((8, na8), lambda b: (0, 0)),
            ],
            out_specs=pl.BlockSpec((1, 24, na8), lambda b: (b, 0, 0)),
        ),
        compiler_params=pltpu.CompilerParams(
            dimension_semantics=("parallel",)),    # batch axis -> v7x megacore
    )(params, ang2d)

    x2 = out[:, 0:8, :].reshape(B, na)
    y2 = out[:, 8:16, :].reshape(B, na)
    e = out[:, 16:24, :].reshape(B, na)
    return x2, y2, e


# ---------------------------------------------------------------------------
# Pure-numpy reference (mirrors the torch semantics) for validation.
# ---------------------------------------------------------------------------
def reference_forward(ang_np, phase, theta, lds_np):
    ang = ang_np.astype(np.float64) + float(phase)
    na = ang.shape[0]
    lds = lds_np.astype(np.float64)
    px = [np.zeros(na), np.full(na, lds[0, 0]), lds[1, 0] * np.cos(ang)]
    py = [np.zeros(na), np.full(na, lds[0, 1]), lds[1, 0] * np.sin(ang)]
    err = np.zeros(na)
    for i in range(NL1, NPTS):
        a, b = PARENTS[i]
        l1, l2 = lds[i - 1, 0], lds[i - 1, 1]
        ax, ay, bx, by = px[a], py[a], px[b], py[b]
        dx, dy = bx - ax, by - ay
        s2 = dx * dx + dy * dy
        d = np.sign(l2)
        T2 = ((l1 + l2) ** 2 - s2) * (s2 - (l1 - l2) ** 2)
        check = T2 / 4.0 / ((np.sqrt(s2) + abs(l1) + abs(l2)) / 3.0) ** 4
        valid = check >= EPS2
        safe_s2 = np.where(s2 > 0.0, s2, 1.0)
        T = np.where(valid, np.sqrt(np.maximum(T2, 0.0)) / (2.0 * safe_s2), 0.0)
        Ut = np.where(valid, (l1 * l1 - l2 * l2) / (2.0 * safe_s2), 0.0)
        e = np.where(valid, 0.0, -(check - EPS2))
        px.append((ax + bx) / 2.0 + dx * Ut - dy * T * d)
        py.append((ay + by) / 2.0 + dy * Ut + dx * T * d)
        err += e
    x0, y0 = px[-1], py[-1]
    ct, st = np.cos(float(theta)), np.sin(float(theta))
    x = x0 * ct + y0 * st
    y = -x0 * st + y0 * ct
    x1 = x - x.mean()
    y1 = y - y.mean()
    std = np.sqrt((x1 * x1 + y1 * y1).mean())
    std1 = (1.0 / (std + 0.01)) if std < 0.1 else 0.0
    return x1 / std, y1 / std, err + std1


if __name__ == "__main__":
    key = jax.random.PRNGKey(0)
    k_theta, k_phase, k_ang = jax.random.split(key, 3)

    # Batch of B parameter sets (mirroring NNB.__init__ shapes); lds is
    # uniformly scaled per batch element (shape-preserving perturbation).
    B = 4
    Na = 1024                                            # Na/8 = 128 lanes
    thetas = jax.random.normal(k_theta, (B,)) * 2.0 * np.pi
    phases = 1.0 + 0.1 * jax.random.normal(k_phase, (B,))
    scales = 1.0 + 0.05 * jnp.arange(B, dtype=jnp.float32)
    lds_batch = jnp.asarray(LDS_NP)[None, :, :] * scales[:, None, None]

    ang = jax.random.uniform(k_ang, (Na,), jnp.float32) * 2.0 * np.pi

    x2, y2, e = nnb_forward(ang, phases, thetas, lds_batch)
    jax.block_until_ready((x2, y2, e))

    # Validate every batch element against the numpy mirror of the torch math.
    for bi in range(B):
        rx, ry, re = reference_forward(np.asarray(ang), float(phases[bi]),
                                       float(thetas[bi]),
                                       np.asarray(lds_batch[bi]))
        np.testing.assert_allclose(np.asarray(x2[bi]), rx, atol=2e-3, rtol=2e-3)
        np.testing.assert_allclose(np.asarray(y2[bi]), ry, atol=2e-3, rtol=2e-3)
        np.testing.assert_allclose(np.asarray(e[bi]), re, atol=2e-3, rtol=2e-3)

    print("KERNEL_OK")
</pallas_src>

<mosaic_0001>
module attributes {stable_mosaic.version = 11 : i64} {
  func.func @nnb_kernel(%arg0: i32, %arg1: memref<4x31xf32, #tpu.memory_space<smem>>, %arg2: memref<8x128xf32, #tpu.memory_space<vmem>>, %arg3: memref<1x24x128xf32, #tpu.memory_space<vmem>>) attributes {dimension_semantics = [#tpu.dimension_semantics<parallel>], iteration_bounds = array<i64: 4>, scalar_prefetch = 0 : i64, scratch_operands = 0 : i64, tpu.core_type = #tpu.core_type<tc>, window_params = [{transform_indices = @transform_0, window_bounds = array<i64: 4, 31>}, {pipeline_mode = #tpu.pipeline_mode<synchronous>, transform_indices = @transform_1, window_bounds = array<i64: 8, 128>}, {transform_indices = @transform_2, window_bounds = array<i64: 1, 24, 128>}]} {
    %0 = arith.index_cast %arg0 : i32 to index
    %c0 = arith.constant 0 : index
    %1 = memref.load %arg1[%0, %c0] : memref<4x31xf32, #tpu.memory_space<smem>>
    %2 = arith.index_cast %arg0 : i32 to index
    %c1 = arith.constant 1 : index
    %3 = memref.load %arg1[%2, %c1] : memref<4x31xf32, #tpu.memory_space<smem>>
    %4 = arith.index_cast %arg0 : i32 to index
    %c2 = arith.constant 2 : index
    %5 = memref.load %arg1[%4, %c2] : memref<4x31xf32, #tpu.memory_space<smem>>
    %6 = arith.index_cast %arg0 : i32 to index
    %c3 = arith.constant 3 : index
    %7 = memref.load %arg1[%6, %c3] : memref<4x31xf32, #tpu.memory_space<smem>>
    %8 = arith.index_cast %arg0 : i32 to index
    %c4 = arith.constant 4 : index
    %9 = memref.load %arg1[%8, %c4] : memref<4x31xf32, #tpu.memory_space<smem>>
    %10 = arith.index_cast %arg0 : i32 to index
    %c5 = arith.constant 5 : index
    %11 = memref.load %arg1[%10, %c5] : memref<4x31xf32, #tpu.memory_space<smem>>
    %c0_0 = arith.constant 0 : index
    %c0_1 = arith.constant 0 : index
    %12 = vector.load %arg2[%c0_0, %c0_1] : memref<8x128xf32, #tpu.memory_space<vmem>>, vector<8x128xf32>
    %13 = vector.broadcast %1 : f32 to vector<8x128xf32>
    %14 = arith.addf %12, %13 : vector<8x128xf32>
    %15 = math.cos %14 : vector<8x128xf32>
    %16 = vector.broadcast %11 : f32 to vector<8x128xf32>
    %17 = arith.mulf %16, %15 : vector<8x128xf32>
    %18 = math.sin %14 : vector<8x128xf32>
    %19 = vector.broadcast %11 : f32 to vector<8x128xf32>
    %20 = arith.mulf %19, %18 : vector<8x128xf32>
    %cst = arith.constant 0.000000e+00 : f32
    %21 = vector.broadcast %cst : f32 to vector<8x128xf32>
    %22 = arith.index_cast %arg0 : i32 to index
    %c6 = arith.constant 6 : index
    %23 = memref.load %arg1[%22, %c6] : memref<4x31xf32, #tpu.memory_space<smem>>
    %24 = arith.index_cast %arg0 : i32 to index
    %c7 = arith.constant 7 : index
    %25 = memref.load %arg1[%24, %c7] : memref<4x31xf32, #tpu.memory_space<smem>>
    %26 = arith.index_cast %arg0 : i32 to index
    %c8 = arith.constant 8 : index
    %27 = memref.load %arg1[%26, %c8] : memref<4x31xf32, #tpu.memory_space<smem>>
    %28 = arith.index_cast %arg0 : i32 to index
    %c9 = arith.constant 9 : index
    %29 = memref.load %arg1[%28, %c9] : memref<4x31xf32, #tpu.memory_space<smem>>
    %30 = arith.index_cast %arg0 : i32 to index
    %c10 = arith.constant 10 : index
    %31 = memref.load %arg1[%30, %c10] : memref<4x31xf32, #tpu.memory_space<smem>>
    %32 = vector.broadcast %7 : f32 to vector<8x128xf32>
    %33 = arith.subf %17, %32 : vector<8x128xf32>
    %34 = vector.broadcast %9 : f32 to vector<8x128xf32>
    %35 = arith.subf %20, %34 : vector<8x128xf32>
    %36 = arith.mulf %33, %33 : vector<8x128xf32>
    %37 = arith.mulf %35, %35 : vector<8x128xf32>
    %38 = arith.addf %36, %37 : vector<8x128xf32>
    %39 = vector.broadcast %23 : f32 to vector<8x128xf32>
    %40 = arith.subf %39, %38 : vector<8x128xf32>
    %41 = vector.broadcast %25 : f32 to vector<8x128xf32>
    %42 = arith.subf %38, %41 : vector<8x128xf32>
    %43 = arith.mulf %40, %42 : vector<8x128xf32>
    %44 = math.sqrt %38 : vector<8x128xf32>
    %45 = vector.broadcast %31 : f32 to vector<8x128xf32>
    %46 = arith.addf %44, %45 : vector<8x128xf32>
    %cst_2 = arith.constant 0.333333343 : f32
    %47 = vector.broadcast %cst_2 : f32 to vector<8x128xf32>
    %48 = arith.mulf %46, %47 : vector<8x128xf32>
    %49 = arith.mulf %48, %48 : vector<8x128xf32>
    %50 = arith.mulf %49, %49 : vector<8x128xf32>
    %cst_3 = arith.constant 2.500000e-01 : f32
    %51 = vector.broadcast %cst_3 : f32 to vector<8x128xf32>
    %52 = arith.mulf %43, %51 : vector<8x128xf32>
    %53 = tpu.reciprocal %50 : vector<8x128xf32> -> vector<8x128xf32>
    %54 = arith.mulf %52, %53 : vector<8x128xf32>
    %cst_4 = arith.constant 9.99999974E-5 : f32
    %55 = vector.broadcast %cst_4 : f32 to vector<8x128xf32>
    %56 = arith.cmpf oge, %54, %55 : vector<8x128xf32>
    %cst_5 = arith.constant 0.000000e+00 : f32
    %57 = vector.broadcast %cst_5 : f32 to vector<8x128xf32>
    %58 = arith.cmpf ogt, %38, %57 : vector<8x128xf32>
    %cst_6 = arith.constant 1.000000e+00 : f32
    %59 = vector.broadcast %cst_6 : f32 to vector<8x128xf32>
    %60 = arith.select %58, %38, %59 : vector<8x128xi1>, vector<8x128xf32>
    %61 = tpu.reciprocal %60 : vector<8x128xf32> -> vector<8x128xf32>
    %cst_7 = arith.constant 5.000000e-01 : f32
    %62 = vector.broadcast %cst_7 : f32 to vector<8x128xf32>
    %63 = arith.mulf %62, %61 : vector<8x128xf32>
    %cst_8 = arith.constant 0.000000e+00 : f32
    %64 = vector.broadcast %cst_8 : f32 to vector<8x128xf32>
    %65 = arith.maximumf %43, %64 : vector<8x128xf32>
    %66 = math.sqrt %65 : vector<8x128xf32>
    %67 = arith.mulf %66, %63 : vector<8x128xf32>
    %cst_9 = arith.constant 0.000000e+00 : f32
    %68 = vector.broadcast %cst_9 : f32 to vector<8x128xf32>
    %69 = arith.select %56, %67, %68 : vector<8x128xi1>, vector<8x128xf32>
    %70 = vector.broadcast %27 : f32 to vector<8x128xf32>
    %71 = arith.mulf %70, %63 : vector<8x128xf32>
    %cst_10 = arith.constant 0.000000e+00 : f32
    %72 = vector.broadcast %cst_10 : f32 to vector<8x128xf32>
    %73 = arith.select %56, %71, %72 : vector<8x128xi1>, vector<8x128xf32>
    %cst_11 = arith.constant 9.99999974E-5 : f32
    %74 = vector.broadcast %cst_11 : f32 to vector<8x128xf32>
    %75 = arith.subf %74, %54 : vector<8x128xf32>
    %cst_12 = arith.constant 0.000000e+00 : f32
    %76 = vector.broadcast %cst_12 : f32 to vector<8x128xf32>
    %77 = arith.select %56, %76, %75 : vector<8x128xi1>, vector<8x128xf32>
    %78 = vector.broadcast %7 : f32 to vector<8x128xf32>
    %79 = arith.addf %78, %17 : vector<8x128xf32>
    %cst_13 = arith.constant 5.000000e-01 : f32
    %80 = vector.broadcast %cst_13 : f32 to vector<8x128xf32>
    %81 = arith.mulf %79, %80 : vector<8x128xf32>
    %82 = arith.mulf %33, %73 : vector<8x128xf32>
    %83 = arith.addf %81, %82 : vector<8x128xf32>
    %84 = arith.mulf %35, %69 : vector<8x128xf32>
    %85 = vector.broadcast %29 : f32 to vector<8x128xf32>
    %86 = arith.mulf %84, %85 : vector<8x128xf32>
    %87 = arith.subf %83, %86 : vector<8x128xf32>
    %88 = vector.broadcast %9 : f32 to vector<8x128xf32>
    %89 = arith.addf %88, %20 : vector<8x128xf32>
    %cst_14 = arith.constant 5.000000e-01 : f32
    %90 = vector.broadcast %cst_14 : f32 to vector<8x128xf32>
    %91 = arith.mulf %89, %90 : vector<8x128xf32>
    %92 = arith.mulf %35, %73 : vector<8x128xf32>
    %93 = arith.addf %91, %92 : vector<8x128xf32>
    %94 = arith.mulf %33, %69 : vector<8x128xf32>
    %95 = vector.broadcast %29 : f32 to vector<8x128xf32>
    %96 = arith.mulf %94, %95 : vector<8x128xf32>
    %97 = arith.addf %93, %96 : vector<8x128xf32>
    %98 = arith.addf %21, %77 : vector<8x128xf32>
    %99 = arith.index_cast %arg0 : i32 to index
    %c11 = arith.constant 11 : index
    %100 = memref.load %arg1[%99, %c11] : memref<4x31xf32, #tpu.memory_space<smem>>
    %101 = arith.index_cast %arg0 : i32 to index
    %c12 = arith.constant 12 : index
    %102 = memref.load %arg1[%101, %c12] : memref<4x31xf32, #tpu.memory_space<smem>>
    %103 = arith.index_cast %arg0 : i32 to index
    %c13 = arith.constant 13 : index
    %104 = memref.load %arg1[%103, %c13] : memref<4x31xf32, #tpu.memory_space<smem>>
    %105 = arith.index_cast %arg0 : i32 to index
    %c14 = arith.constant 14 : index
    %106 = memref.load %arg1[%105, %c14] : memref<4x31xf32, #tpu.memory_space<smem>>
    %107 = arith.index_cast %arg0 : i32 to index
    %c15 = arith.constant 15 : index
    %108 = memref.load %arg1[%107, %c15] : memref<4x31xf32, #tpu.memory_space<smem>>
    %cst_15 = arith.constant 0.000000e+00 : f32
    %109 = vector.broadcast %cst_15 : f32 to vector<8x128xf32>
    %110 = arith.subf %87, %109 : vector<8x128xf32>
    %cst_16 = arith.constant 0.000000e+00 : f32
    %111 = vector.broadcast %cst_16 : f32 to vector<8x128xf32>
    %112 = arith.subf %97, %111 : vector<8x128xf32>
    %113 = arith.mulf %110, %110 : vector<8x128xf32>
    %114 = arith.mulf %112, %112 : vector<8x128xf32>
    %115 = arith.addf %113, %114 : vector<8x128xf32>
    %116 = vector.broadcast %100 : f32 to vector<8x128xf32>
    %117 = arith.subf %116, %115 : vector<8x128xf32>
    %118 = vector.broadcast %102 : f32 to vector<8x128xf32>
    %119 = arith.subf %115, %118 : vector<8x128xf32>
    %120 = arith.mulf %117, %119 : vector<8x128xf32>
    %121 = math.sqrt %115 : vector<8x128xf32>
    %122 = vector.broadcast %108 : f32 to vector<8x128xf32>
    %123 = arith.addf %121, %122 : vector<8x128xf32>
    %cst_17 = arith.constant 0.333333343 : f32
    %124 = vector.broadcast %cst_17 : f32 to vector<8x128xf32>
    %125 = arith.mulf %123, %124 : vector<8x128xf32>
    %126 = arith.mulf %125, %125 : vector<8x128xf32>
    %127 = arith.mulf %126, %126 : vector<8x128xf32>
    %cst_18 = arith.constant 2.500000e-01 : f32
    %128 = vector.broadcast %cst_18 : f32 to vector<8x128xf32>
    %129 = arith.mulf %120, %128 : vector<8x128xf32>
    %130 = tpu.reciprocal %127 : vector<8x128xf32> -> vector<8x128xf32>
    %131 = arith.mulf %129, %130 : vector<8x128xf32>
    %cst_19 = arith.constant 9.99999974E-5 : f32
    %132 = vector.broadcast %cst_19 : f32 to vector<8x128xf32>
    %133 = arith.cmpf oge, %131, %132 : vector<8x128xf32>
    %cst_20 = arith.constant 0.000000e+00 : f32
    %134 = vector.broadcast %cst_20 : f32 to vector<8x128xf32>
    %135 = arith.cmpf ogt, %115, %134 : vector<8x128xf32>
    %cst_21 = arith.constant 1.000000e+00 : f32
    %136 = vector.broadcast %cst_21 : f32 to vector<8x128xf32>
    %137 = arith.select %135, %115, %136 : vector<8x128xi1>, vector<8x128xf32>
    %138 = tpu.reciprocal %137 : vector<8x128xf32> -> vector<8x128xf32>
    %cst_22 = arith.constant 5.000000e-01 : f32
    %139 = vector.broadcast %cst_22 : f32 to vector<8x128xf32>
    %140 = arith.mulf %139, %138 : vector<8x128xf32>
    %cst_23 = arith.constant 0.000000e+00 : f32
    %141 = vector.broadcast %cst_23 : f32 to vector<8x128xf32>
    %142 = arith.maximumf %120, %141 : vector<8x128xf32>
    %143 = math.sqrt %142 : vector<8x128xf32>
    %144 = arith.mulf %143, %140 : vector<8x128xf32>
    %cst_24 = arith.constant 0.000000e+00 : f32
    %145 = vector.broadcast %cst_24 : f32 to vector<8x128xf32>
    %146 = arith.select %133, %144, %145 : vector<8x128xi1>, vector<8x128xf32>
    %147 = vector.broadcast %104 : f32 to vector<8x128xf32>
    %148 = arith.mulf %147, %140 : vector<8x128xf32>
    %cst_25 = arith.constant 0.000000e+00 : f32
    %149 = vector.broadcast %cst_25 : f32 to vector<8x128xf32>
    %150 = arith.select %133, %148, %149 : vector<8x128xi1>, vector<8x128xf32>
    %cst_26 = arith.constant 9.99999974E-5 : f32
    %151 = vector.broadcast %cst_26 : f32 to vector<8x128xf32>
    %152 = arith.subf %151, %131 : vector<8x128xf32>
    %cst_27 = arith.constant 0.000000e+00 : f32
    %153 = vector.broadcast %cst_27 : f32 to vector<8x128xf32>
    %154 = arith.select %133, %153, %152 : vector<8x128xi1>, vector<8x128xf32>
    %cst_28 = arith.constant 0.000000e+00 : f32
    %155 = vector.broadcast %cst_28 : f32 to vector<8x128xf32>
    %156 = arith.addf %155, %87 : vector<8x128xf32>
    %cst_29 = arith.constant 5.000000e-01 : f32
    %157 = vector.broadcast %cst_29 : f32 to vector<8x128xf32>
    %158 = arith.mulf %156, %157 : vector<8x128xf32>
    %159 = arith.mulf %110, %150 : vector<8x128xf32>
    %160 = arith.addf %158, %159 : vector<8x128xf32>
    %161 = arith.mulf %112, %146 : vector<8x128xf32>
    %162 = vector.broadcast %106 : f32 to vector<8x128xf32>
    %163 = arith.mulf %161, %162 : vector<8x128xf32>
    %164 = arith.subf %160, %163 : vector<8x128xf32>
    %cst_30 = arith.constant 0.000000e+00 : f32
    %165 = vector.broadcast %cst_30 : f32 to vector<8x128xf32>
    %166 = arith.addf %165, %97 : vector<8x128xf32>
    %cst_31 = arith.constant 5.000000e-01 : f32
    %167 = vector.broadcast %cst_31 : f32 to vector<8x128xf32>
    %168 = arith.mulf %166, %167 : vector<8x128xf32>
    %169 = arith.mulf %112, %150 : vector<8x128xf32>
    %170 = arith.addf %168, %169 : vector<8x128xf32>
    %171 = arith.mulf %110, %146 : vector<8x128xf32>
    %172 = vector.broadcast %106 : f32 to vector<8x128xf32>
    %173 = arith.mulf %171, %172 : vector<8x128xf32>
    %174 = arith.addf %170, %173 : vector<8x128xf32>
    %175 = arith.addf %98, %154 : vector<8x128xf32>
    %176 = arith.index_cast %arg0 : i32 to index
    %c16 = arith.constant 16 : index
    %177 = memref.load %arg1[%176, %c16] : memref<4x31xf32, #tpu.memory_space<smem>>
    %178 = arith.index_cast %arg0 : i32 to index
    %c17 = arith.constant 17 : index
    %179 = memref.load %arg1[%178, %c17] : memref<4x31xf32, #tpu.memory_space<smem>>
    %180 = arith.index_cast %arg0 : i32 to index
    %c18 = arith.constant 18 : index
    %181 = memref.load %arg1[%180, %c18] : memref<4x31xf32, #tpu.memory_space<smem>>
    %182 = arith.index_cast %arg0 : i32 to index
    %c19 = arith.constant 19 : index
    %183 = memref.load %arg1[%182, %c19] : memref<4x31xf32, #tpu.memory_space<smem>>
    %184 = arith.index_cast %arg0 : i32 to index
    %c20 = arith.constant 20 : index
    %185 = memref.load %arg1[%184, %c20] : memref<4x31xf32, #tpu.memory_space<smem>>
    %186 = arith.subf %164, %87 : vector<8x128xf32>
    %187 = arith.subf %174, %97 : vector<8x128xf32>
    %188 = arith.mulf %186, %186 : vector<8x128xf32>
    %189 = arith.mulf %187, %187 : vector<8x128xf32>
    %190 = arith.addf %188, %189 : vector<8x128xf32>
    %191 = vector.broadcast %177 : f32 to vector<8x128xf32>
    %192 = arith.subf %191, %190 : vector<8x128xf32>
    %193 = vector.broadcast %179 : f32 to vector<8x128xf32>
    %194 = arith.subf %190, %193 : vector<8x128xf32>
    %195 = arith.mulf %192, %194 : vector<8x128xf32>
    %196 = math.sqrt %190 : vector<8x128xf32>
    %197 = vector.broadcast %185 : f32 to vector<8x128xf32>
    %198 = arith.addf %196, %197 : vector<8x128xf32>
    %cst_32 = arith.constant 0.333333343 : f32
    %199 = vector.broadcast %cst_32 : f32 to vector<8x128xf32>
    %200 = arith.mulf %198, %199 : vector<8x128xf32>
    %201 = arith.mulf %200, %200 : vector<8x128xf32>
    %202 = arith.mulf %201, %201 : vector<8x128xf32>
    %cst_33 = arith.constant 2.500000e-01 : f32
    %203 = vector.broadcast %cst_33 : f32 to vector<8x128xf32>
    %204 = arith.mulf %195, %203 : vector<8x128xf32>
    %205 = tpu.reciprocal %202 : vector<8x128xf32> -> vector<8x128xf32>
    %206 = arith.mulf %204, %205 : vector<8x128xf32>
    %cst_34 = arith.constant 9.99999974E-5 : f32
    %207 = vector.broadcast %cst_34 : f32 to vector<8x128xf32>
    %208 = arith.cmpf oge, %206, %207 : vector<8x128xf32>
    %cst_35 = arith.constant 0.000000e+00 : f32
    %209 = vector.broadcast %cst_35 : f32 to vector<8x128xf32>
    %210 = arith.cmpf ogt, %190, %209 : vector<8x128xf32>
    %cst_36 = arith.constant 1.000000e+00 : f32
    %211 = vector.broadcast %cst_36 : f32 to vector<8x128xf32>
    %212 = arith.select %210, %190, %211 : vector<8x128xi1>, vector<8x128xf32>
    %213 = tpu.reciprocal %212 : vector<8x128xf32> -> vector<8x128xf32>
    %cst_37 = arith.constant 5.000000e-01 : f32
    %214 = vector.broadcast %cst_37 : f32 to vector<8x128xf32>
    %215 = arith.mulf %214, %213 : vector<8x128xf32>
    %cst_38 = arith.constant 0.000000e+00 : f32
    %216 = vector.broadcast %cst_38 : f32 to vector<8x128xf32>
    %217 = arith.maximumf %195, %216 : vector<8x128xf32>
    %218 = math.sqrt %217 : vector<8x128xf32>
    %219 = arith.mulf %218, %215 : vector<8x128xf32>
    %cst_39 = arith.constant 0.000000e+00 : f32
    %220 = vector.broadcast %cst_39 : f32 to vector<8x128xf32>
    %221 = arith.select %208, %219, %220 : vector<8x128xi1>, vector<8x128xf32>
    %222 = vector.broadcast %181 : f32 to vector<8x128xf32>
    %223 = arith.mulf %222, %215 : vector<8x128xf32>
    %cst_40 = arith.constant 0.000000e+00 : f32
    %224 = vector.broadcast %cst_40 : f32 to vector<8x128xf32>
    %225 = arith.select %208, %223, %224 : vector<8x128xi1>, vector<8x128xf32>
    %cst_41 = arith.constant 9.99999974E-5 : f32
    %226 = vector.broadcast %cst_41 : f32 to vector<8x128xf32>
    %227 = arith.subf %226, %206 : vector<8x128xf32>
    %cst_42 = arith.constant 0.000000e+00 : f32
    %228 = vector.broadcast %cst_42 : f32 to vector<8x128xf32>
    %229 = arith.select %208, %228, %227 : vector<8x128xi1>, vector<8x128xf32>
    %230 = arith.addf %87, %164 : vector<8x128xf32>
    %cst_43 = arith.constant 5.000000e-01 : f32
    %231 = vector.broadcast %cst_43 : f32 to vector<8x128xf32>
    %232 = arith.mulf %230, %231 : vector<8x128xf32>
    %233 = arith.mulf %186, %225 : vector<8x128xf32>
    %234 = arith.addf %232, %233 : vector<8x128xf32>
    %235 = arith.mulf %187, %221 : vector<8x128xf32>
    %236 = vector.broadcast %183 : f32 to vector<8x128xf32>
    %237 = arith.mulf %235, %236 : vector<8x128xf32>
    %238 = arith.subf %234, %237 : vector<8x128xf32>
    %239 = arith.addf %97, %174 : vector<8x128xf32>
    %cst_44 = arith.constant 5.000000e-01 : f32
    %240 = vector.broadcast %cst_44 : f32 to vector<8x128xf32>
    %241 = arith.mulf %239, %240 : vector<8x128xf32>
    %242 = arith.mulf %187, %225 : vector<8x128xf32>
    %243 = arith.addf %241, %242 : vector<8x128xf32>
    %244 = arith.mulf %186, %221 : vector<8x128xf32>
    %245 = vector.broadcast %183 : f32 to vector<8x128xf32>
    %246 = arith.mulf %244, %245 : vector<8x128xf32>
    %247 = arith.addf %243, %246 : vector<8x128xf32>
    %248 = arith.addf %175, %229 : vector<8x128xf32>
    %249 = arith.index_cast %arg0 : i32 to index
    %c21 = arith.constant 21 : index
    %250 = memref.load %arg1[%249, %c21] : memref<4x31xf32, #tpu.memory_space<smem>>
    %251 = arith.index_cast %arg0 : i32 to index
    %c22 = arith.constant 22 : index
    %252 = memref.load %arg1[%251, %c22] : memref<4x31xf32, #tpu.memory_space<smem>>
    %253 = arith.index_cast %arg0 : i32 to index
    %c23 = arith.constant 23 : index
    %254 = memref.load %arg1[%253, %c23] : memref<4x31xf32, #tpu.memory_space<smem>>
    %255 = arith.index_cast %arg0 : i32 to index
    %c24 = arith.constant 24 : index
    %256 = memref.load %arg1[%255, %c24] : memref<4x31xf32, #tpu.memory_space<smem>>
    %257 = arith.index_cast %arg0 : i32 to index
    %c25 = arith.constant 25 : index
    %258 = memref.load %arg1[%257, %c25] : memref<4x31xf32, #tpu.memory_space<smem>>
    %259 = arith.subf %238, %17 : vector<8x128xf32>
    %260 = arith.subf %247, %20 : vector<8x128xf32>
    %261 = arith.mulf %259, %259 : vector<8x128xf32>
    %262 = arith.mulf %260, %260 : vector<8x128xf32>
    %263 = arith.addf %261, %262 : vector<8x128xf32>
    %264 = vector.broadcast %250 : f32 to vector<8x128xf32>
    %265 = arith.subf %264, %263 : vector<8x128xf32>
    %266 = vector.broadcast %252 : f32 to vector<8x128xf32>
    %267 = arith.subf %263, %266 : vector<8x128xf32>
    %268 = arith.mulf %265, %267 : vector<8x128xf32>
    %269 = math.sqrt %263 : vector<8x128xf32>
    %270 = vector.broadcast %258 : f32 to vector<8x128xf32>
    %271 = arith.addf %269, %270 : vector<8x128xf32>
    %cst_45 = arith.constant 0.333333343 : f32
    %272 = vector.broadcast %cst_45 : f32 to vector<8x128xf32>
    %273 = arith.mulf %271, %272 : vector<8x128xf32>
    %274 = arith.mulf %273, %273 : vector<8x128xf32>
    %275 = arith.mulf %274, %274 : vector<8x128xf32>
    %cst_46 = arith.constant 2.500000e-01 : f32
    %276 = vector.broadcast %cst_46 : f32 to vector<8x128xf32>
    %277 = arith.mulf %268, %276 : vector<8x128xf32>
    %278 = tpu.reciprocal %275 : vector<8x128xf32> -> vector<8x128xf32>
    %279 = arith.mulf %277, %278 : vector<8x128xf32>
    %cst_47 = arith.constant 9.99999974E-5 : f32
    %280 = vector.broadcast %cst_47 : f32 to vector<8x128xf32>
    %281 = arith.cmpf oge, %279, %280 : vector<8x128xf32>
    %cst_48 = arith.constant 0.000000e+00 : f32
    %282 = vector.broadcast %cst_48 : f32 to vector<8x128xf32>
    %283 = arith.cmpf ogt, %263, %282 : vector<8x128xf32>
    %cst_49 = arith.constant 1.000000e+00 : f32
    %284 = vector.broadcast %cst_49 : f32 to vector<8x128xf32>
    %285 = arith.select %283, %263, %284 : vector<8x128xi1>, vector<8x128xf32>
    %286 = tpu.reciprocal %285 : vector<8x128xf32> -> vector<8x128xf32>
    %cst_50 = arith.constant 5.000000e-01 : f32
    %287 = vector.broadcast %cst_50 : f32 to vector<8x128xf32>
    %288 = arith.mulf %287, %286 : vector<8x128xf32>
    %cst_51 = arith.constant 0.000000e+00 : f32
    %289 = vector.broadcast %cst_51 : f32 to vector<8x128xf32>
    %290 = arith.maximumf %268, %289 : vector<8x128xf32>
    %291 = math.sqrt %290 : vector<8x128xf32>
    %292 = arith.mulf %291, %288 : vector<8x128xf32>
    %cst_52 = arith.constant 0.000000e+00 : f32
    %293 = vector.broadcast %cst_52 : f32 to vector<8x128xf32>
    %294 = arith.select %281, %292, %293 : vector<8x128xi1>, vector<8x128xf32>
    %295 = vector.broadcast %254 : f32 to vector<8x128xf32>
    %296 = arith.mulf %295, %288 : vector<8x128xf32>
    %cst_53 = arith.constant 0.000000e+00 : f32
    %297 = vector.broadcast %cst_53 : f32 to vector<8x128xf32>
    %298 = arith.select %281, %296, %297 : vector<8x128xi1>, vector<8x128xf32>
    %cst_54 = arith.constant 9.99999974E-5 : f32
    %299 = vector.broadcast %cst_54 : f32 to vector<8x128xf32>
    %300 = arith.subf %299, %279 : vector<8x128xf32>
    %cst_55 = arith.constant 0.000000e+00 : f32
    %301 = vector.broadcast %cst_55 : f32 to vector<8x128xf32>
    %302 = arith.select %281, %301, %300 : vector<8x128xi1>, vector<8x128xf32>
    %303 = arith.addf %17, %238 : vector<8x128xf32>
    %cst_56 = arith.constant 5.000000e-01 : f32
    %304 = vector.broadcast %cst_56 : f32 to vector<8x128xf32>
    %305 = arith.mulf %303, %304 : vector<8x128xf32>
    %306 = arith.mulf %259, %298 : vector<8x128xf32>
    %307 = arith.addf %305, %306 : vector<8x128xf32>
    %308 = arith.mulf %260, %294 : vector<8x128xf32>
    %309 = vector.broadcast %256 : f32 to vector<8x128xf32>
    %310 = arith.mulf %308, %309 : vector<8x128xf32>
    %311 = arith.subf %307, %310 : vector<8x128xf32>
    %312 = arith.addf %20, %247 : vector<8x128xf32>
    %cst_57 = arith.constant 5.000000e-01 : f32
    %313 = vector.broadcast %cst_57 : f32 to vector<8x128xf32>
    %314 = arith.mulf %312, %313 : vector<8x128xf32>
    %315 = arith.mulf %260, %298 : vector<8x128xf32>
    %316 = arith.addf %314, %315 : vector<8x128xf32>
    %317 = arith.mulf %259, %294 : vector<8x128xf32>
    %318 = vector.broadcast %256 : f32 to vector<8x128xf32>
    %319 = arith.mulf %317, %318 : vector<8x128xf32>
    %320 = arith.addf %316, %319 : vector<8x128xf32>
    %321 = arith.addf %248, %302 : vector<8x128xf32>
    %322 = arith.index_cast %arg0 : i32 to index
    %c26 = arith.constant 26 : index
    %323 = memref.load %arg1[%322, %c26] : memref<4x31xf32, #tpu.memory_space<smem>>
    %324 = arith.index_cast %arg0 : i32 to index
    %c27 = arith.constant 27 : index
    %325 = memref.load %arg1[%324, %c27] : memref<4x31xf32, #tpu.memory_space<smem>>
    %326 = arith.index_cast %arg0 : i32 to index
    %c28 = arith.constant 28 : index
    %327 = memref.load %arg1[%326, %c28] : memref<4x31xf32, #tpu.memory_space<smem>>
    %328 = arith.index_cast %arg0 : i32 to index
    %c29 = arith.constant 29 : index
    %329 = memref.load %arg1[%328, %c29] : memref<4x31xf32, #tpu.memory_space<smem>>
    %330 = arith.index_cast %arg0 : i32 to index
    %c30 = arith.constant 30 : index
    %331 = memref.load %arg1[%330, %c30] : memref<4x31xf32, #tpu.memory_space<smem>>
    %332 = arith.subf %311, %164 : vector<8x128xf32>
    %333 = arith.subf %320, %174 : vector<8x128xf32>
    %334 = arith.mulf %332, %332 : vector<8x128xf32>
    %335 = arith.mulf %333, %333 : vector<8x128xf32>
    %336 = arith.addf %334, %335 : vector<8x128xf32>
    %337 = vector.broadcast %323 : f32 to vector<8x128xf32>
    %338 = arith.subf %337, %336 : vector<8x128xf32>
    %339 = vector.broadcast %325 : f32 to vector<8x128xf32>
    %340 = arith.subf %336, %339 : vector<8x128xf32>
    %341 = arith.mulf %338, %340 : vector<8x128xf32>
    %342 = math.sqrt %336 : vector<8x128xf32>
    %343 = vector.broadcast %331 : f32 to vector<8x128xf32>
    %344 = arith.addf %342, %343 : vector<8x128xf32>
    %cst_58 = arith.constant 0.333333343 : f32
    %345 = vector.broadcast %cst_58 : f32 to vector<8x128xf32>
    %346 = arith.mulf %344, %345 : vector<8x128xf32>
    %347 = arith.mulf %346, %346 : vector<8x128xf32>
    %348 = arith.mulf %347, %347 : vector<8x128xf32>
    %cst_59 = arith.constant 2.500000e-01 : f32
    %349 = vector.broadcast %cst_59 : f32 to vector<8x128xf32>
    %350 = arith.mulf %341, %349 : vector<8x128xf32>
    %351 = tpu.reciprocal %348 : vector<8x128xf32> -> vector<8x128xf32>
    %352 = arith.mulf %350, %351 : vector<8x128xf32>
    %cst_60 = arith.constant 9.99999974E-5 : f32
    %353 = vector.broadcast %cst_60 : f32 to vector<8x128xf32>
    %354 = arith.cmpf oge, %352, %353 : vector<8x128xf32>
    %cst_61 = arith.constant 0.000000e+00 : f32
    %355 = vector.broadcast %cst_61 : f32 to vector<8x128xf32>
    %356 = arith.cmpf ogt, %336, %355 : vector<8x128xf32>
    %cst_62 = arith.constant 1.000000e+00 : f32
    %357 = vector.broadcast %cst_62 : f32 to vector<8x128xf32>
    %358 = arith.select %356, %336, %357 : vector<8x128xi1>, vector<8x128xf32>
    %359 = tpu.reciprocal %358 : vector<8x128xf32> -> vector<8x128xf32>
    %cst_63 = arith.constant 5.000000e-01 : f32
    %360 = vector.broadcast %cst_63 : f32 to vector<8x128xf32>
    %361 = arith.mulf %360, %359 : vector<8x128xf32>
    %cst_64 = arith.constant 0.000000e+00 : f32
    %362 = vector.broadcast %cst_64 : f32 to vector<8x128xf32>
    %363 = arith.maximumf %341, %362 : vector<8x128xf32>
    %364 = math.sqrt %363 : vector<8x128xf32>
    %365 = arith.mulf %364, %361 : vector<8x128xf32>
    %cst_65 = arith.constant 0.000000e+00 : f32
    %366 = vector.broadcast %cst_65 : f32 to vector<8x128xf32>
    %367 = arith.select %354, %365, %366 : vector<8x128xi1>, vector<8x128xf32>
    %368 = vector.broadcast %327 : f32 to vector<8x128xf32>
    %369 = arith.mulf %368, %361 : vector<8x128xf32>
    %cst_66 = arith.constant 0.000000e+00 : f32
    %370 = vector.broadcast %cst_66 : f32 to vector<8x128xf32>
    %371 = arith.select %354, %369, %370 : vector<8x128xi1>, vector<8x128xf32>
    %cst_67 = arith.constant 9.99999974E-5 : f32
    %372 = vector.broadcast %cst_67 : f32 to vector<8x128xf32>
    %373 = arith.subf %372, %352 : vector<8x128xf32>
    %cst_68 = arith.constant 0.000000e+00 : f32
    %374 = vector.broadcast %cst_68 : f32 to vector<8x128xf32>
    %375 = arith.select %354, %374, %373 : vector<8x128xi1>, vector<8x128xf32>
    %376 = arith.addf %164, %311 : vector<8x128xf32>
    %cst_69 = arith.constant 5.000000e-01 : f32
    %377 = vector.broadcast %cst_69 : f32 to vector<8x128xf32>
    %378 = arith.mulf %376, %377 : vector<8x128xf32>
    %379 = arith.mulf %332, %371 : vector<8x128xf32>
    %380 = arith.addf %378, %379 : vector<8x128xf32>
    %381 = arith.mulf %333, %367 : vector<8x128xf32>
    %382 = vector.broadcast %329 : f32 to vector<8x128xf32>
    %383 = arith.mulf %381, %382 : vector<8x128xf32>
    %384 = arith.subf %380, %383 : vector<8x128xf32>
    %385 = arith.addf %174, %320 : vector<8x128xf32>
    %cst_70 = arith.constant 5.000000e-01 : f32
    %386 = vector.broadcast %cst_70 : f32 to vector<8x128xf32>
    %387 = arith.mulf %385, %386 : vector<8x128xf32>
    %388 = arith.mulf %333, %371 : vector<8x128xf32>
    %389 = arith.addf %387, %388 : vector<8x128xf32>
    %390 = arith.mulf %332, %367 : vector<8x128xf32>
    %391 = vector.broadcast %329 : f32 to vector<8x128xf32>
    %392 = arith.mulf %390, %391 : vector<8x128xf32>
    %393 = arith.addf %389, %392 : vector<8x128xf32>
    %394 = arith.addf %321, %375 : vector<8x128xf32>
    %395 = vector.broadcast %3 : f32 to vector<8x128xf32>
    %396 = arith.mulf %384, %395 : vector<8x128xf32>
    %397 = vector.broadcast %5 : f32 to vector<8x128xf32>
    %398 = arith.mulf %393, %397 : vector<8x128xf32>
    %399 = arith.addf %396, %398 : vector<8x128xf32>
    %cst_71 = arith.constant 0.000000e+00 : f32
    %400 = vector.broadcast %cst_71 : f32 to vector<8x128xf32>
    %401 = arith.subf %400, %384 : vector<8x128xf32>
    %402 = vector.broadcast %5 : f32 to vector<8x128xf32>
    %403 = arith.mulf %401, %402 : vector<8x128xf32>
    %404 = vector.broadcast %3 : f32 to vector<8x128xf32>
    %405 = arith.mulf %393, %404 : vector<8x128xf32>
    %406 = arith.addf %403, %405 : vector<8x128xf32>
    %407 = vector.shape_cast %399 : vector<8x128xf32> to vector<1x8x128xf32>
    %cst_72 = arith.constant dense<0.000000e+00> : vector<1xf32>
    %408 = vector.multi_reduction <add>, %407, %cst_72 [1, 2] : vector<1x8x128xf32> to vector<1xf32>
    %409 = vector.shape_cast %408 : vector<1xf32> to vector<1x1x1xf32>
    %410 = vector.extract %409[0, 0, 0] : f32 from vector<1x1x1xf32>
    %cst_73 = arith.constant 1.024000e+03 : f32
    %411 = arith.divf %410, %cst_73 : f32
    %412 = vector.broadcast %411 : f32 to vector<8x128xf32>
    %413 = arith.subf %399, %412 : vector<8x128xf32>
    %414 = vector.shape_cast %406 : vector<8x128xf32> to vector<1x8x128xf32>
    %cst_74 = arith.constant dense<0.000000e+00> : vector<1xf32>
    %415 = vector.multi_reduction <add>, %414, %cst_74 [1, 2] : vector<1x8x128xf32> to vector<1xf32>
    %416 = vector.shape_cast %415 : vector<1xf32> to vector<1x1x1xf32>
    %417 = vector.extract %416[0, 0, 0] : f32 from vector<1x1x1xf32>
    %cst_75 = arith.constant 1.024000e+03 : f32
    %418 = arith.divf %417, %cst_75 : f32
    %419 = vector.broadcast %418 : f32 to vector<8x128xf32>
    %420 = arith.subf %406, %419 : vector<8x128xf32>
    %421 = arith.mulf %413, %413 : vector<8x128xf32>
    %422 = arith.mulf %420, %420 : vector<8x128xf32>
    %423 = arith.addf %421, %422 : vector<8x128xf32>
    %424 = vector.shape_cast %423 : vector<8x128xf32> to vector<1x8x128xf32>
    %cst_76 = arith.constant dense<0.000000e+00> : vector<1xf32>
    %425 = vector.multi_reduction <add>, %424, %cst_76 [1, 2] : vector<1x8x128xf32> to vector<1xf32>
    %426 = vector.shape_cast %425 : vector<1xf32> to vector<1x1x1xf32>
    %427 = vector.extract %426[0, 0, 0] : f32 from vector<1x1x1xf32>
    %cst_77 = arith.constant 1.024000e+03 : f32
    %428 = arith.divf %427, %cst_77 : f32
    %429 = math.rsqrt %428 : f32
    %430 = arith.mulf %428, %429 : f32
    %cst_78 = arith.constant 1.000000e-01 : f32
    %431 = arith.cmpf olt, %430, %cst_78 : f32
    %cst_79 = arith.constant 0.00999999977 : f32
    %432 = arith.addf %430, %cst_79 : f32
    %cst_80 = arith.constant 1.000000e+00 : f32
    %433 = arith.divf %cst_80, %432 : f32
    %cst_81 = arith.constant 0.000000e+00 : f32
    %434 = arith.select %431, %433, %cst_81 : f32
    %435 = vector.broadcast %429 : f32 to vector<8x128xf32>
    %436 = arith.mulf %413, %435 : vector<8x128xf32>
    %c0_82 = arith.constant 0 : index
    %c0_83 = arith.constant 0 : index
    %c0_84 = arith.constant 0 : index
    %437 = vector.load %arg3[%c0_82, %c0_83, %c0_84] : memref<1x24x128xf32, #tpu.memory_space<vmem>>, vector<1x8x128xf32>
    %438 = vector.shape_cast %437 : vector<1x8x128xf32> to vector<8x128xf32>
    %439 = vector.shape_cast %436 : vector<8x128xf32> to vector<1x8x128xf32>
    tpu.vector_store %arg3[%c0_82, %c0_83, %c0_84], %439 {strides = array<i32>} : memref<1x24x128xf32, #tpu.memory_space<vmem>>, vector<1x8x128xf32>,
    %440 = vector.broadcast %429 : f32 to vector<8x128xf32>
    %441 = arith.mulf %420, %440 : vector<8x128xf32>
    %c0_85 = arith.constant 0 : index
    %c8_86 = arith.constant 8 : index
    %c0_87 = arith.constant 0 : index
    %442 = vector.load %arg3[%c0_85, %c8_86, %c0_87] : memref<1x24x128xf32, #tpu.memory_space<vmem>>, vector<1x8x128xf32>
    %443 = vector.shape_cast %442 : vector<1x8x128xf32> to vector<8x128xf32>
    %444 = vector.shape_cast %441 : vector<8x128xf32> to vector<1x8x128xf32>
    tpu.vector_store %arg3[%c0_85, %c8_86, %c0_87], %444 {strides = array<i32>} : memref<1x24x128xf32, #tpu.memory_space<vmem>>, vector<1x8x128xf32>,
    %445 = vector.broadcast %434 : f32 to vector<8x128xf32>
    %446 = arith.addf %394, %445 : vector<8x128xf32>
    %c0_88 = arith.constant 0 : index
    %c16_89 = arith.constant 16 : index
    %c0_90 = arith.constant 0 : index
    %447 = vector.load %arg3[%c0_88, %c16_89, %c0_90] : memref<1x24x128xf32, #tpu.memory_space<vmem>>, vector<1x8x128xf32>
    %448 = vector.shape_cast %447 : vector<1x8x128xf32> to vector<8x128xf32>
    %449 = vector.shape_cast %446 : vector<8x128xf32> to vector<1x8x128xf32>
    tpu.vector_store %arg3[%c0_88, %c16_89, %c0_90], %449 {strides = array<i32>} : memref<1x24x128xf32, #tpu.memory_space<vmem>>, vector<1x8x128xf32>,
    return
  }
  func.func @transform_0(%arg0: i32) -> (i32, i32) {
    %c0_i32 = arith.constant 0 : i32
    %c0_i32_0 = arith.constant 0 : i32
    %c0_i32_1 = arith.constant 0 : i32
    return %c0_i32, %c0_i32_0 : i32, i32
  }
  func.func @transform_1(%arg0: i32) -> (i32, i32) {
    %c0_i32 = arith.constant 0 : i32
    %c0_i32_0 = arith.constant 0 : i32
    %c0_i32_1 = arith.constant 0 : i32
    return %c0_i32, %c0_i32_0 : i32, i32
  }
  func.func @transform_2(%arg0: i32) -> (i32, i32, i32) {
    %c0_i32 = arith.constant 0 : i32
    %c0_i32_0 = arith.constant 0 : i32
    %c0_i32_1 = arith.constant 0 : i32
    return %arg0, %c0_i32, %c0_i32_0 : i32, i32, i32
  }
}

</mosaic_0001>

<bundles_post_ra>
// kernel: tpu_custom_call.1
= control target key start
LH: loop header
LB: loop body
LE: loop exit
PB: predicated region body
PF: predicated region fallthrough
CT: control target
= control target key end

     0   :  { %7 = vsyncpa [#allocation5], 0  ;;  %s1947_s0 = inlined_call_operand.hbm [shape: f32[4,31], index: 0, kind: input, shape index: {}]   ;;  %s1948_s1 = inlined_call_operand.hbm [shape: f32[8,128], index: 1, kind: input, shape index: {}]   ;;  %s1949_s2 = inlined_call_operand.hbm [shape: f32[4,24,128], index: 2, kind: output, shape index: {}]  }
   0x1   :  { %8 = vsyncpa [#allocation3], 0 }
   0x2   :  { %9 = vsyncpa [#allocation4], 0 }
   0x3   :  { %11 = vsyncpa [#allocation4 + $0x1], 0  ;;  %s1504_s9 = smov 0   ;;  %s1506_s10 = smov 0  }
   0x4   :  { %s1508_s11 = smov 0   ;;  %s1510_s12 = smov 0  }
   0x5 LB: > { %s1525_s13 = sadd.s32 4294967295, %s1475_s12   ;;  %s1213_s14 = sadd.s32 4294967294, %s1475_s12   ;;  %s1475_s12 = sphi %s1510_s12, %s1955_s12   ;;  %s1471_s11 = sphi %s1508_s11, %s1954_s11   ;;  %s1467_s10 = sphi %s1506_s10, %s1953_s10   ;;  %s1463_s9 = sphi %s1504_s9, %s1952_s9  }
   0x6   : > { %s1529_s15 = sadd.s32 1, %s1475_s12   ;;  %s66_s16 = sadd.s32 1, %s1471_s11 }
   0x7   : > { %s63_s17 = ssub.s32 %s1475_s12, %s1529_s15  ;;  %p76_p0 = scmp.ne.s32.totalorder %s1471_s11, %s1467_s10 }
   0x8   : > { %p64_p1 = scmp.eq.s32.totalorder %s63_s17, 0  ;;  %p77_p2 = scmp.eq.s32.totalorder %s1525_s13, 3 }
   0x9   : > { %p82_p3 = scmp.ne.s32.totalorder %s1467_s10, %s1463_s9  ;;  %p83_p4 = scmp.eq.s32.totalorder %s1213_s14, 3 }
   0xa   : > { %s1540_s18 = scalar_select %p64_p1, %s1471_s11, %s66_s16  }
   0xb   : > { %p1542_p5 = por %p77_p2, %p76_p0  ;;  %p1546_p6 = por %p83_p4, %p82_p3 }
   0xc   : > { %p1214_p7 = scmp.ge.s32.totalorder %s1475_s12, 1  ;;  %p90_p8 = scmp.lt.s32.totalorder %s1475_s12, 5 }
   0xd   : > { %p1265_p9 = scmp.eq.s32.totalorder %s1525_s13, 0  ;;  %s102_s23 = sshll.u32 %s1947_s0, 4  ;;  %s103_s23 = int_to_ptr.hbm [resolvable:$true] %s102_s23 }
   0xe   : > { %p91_p10 = pnand %p1214_p7, %p90_p8  ;;  %s112_s26 = sshll.u32 %s1948_s1, 4  ;;  %s113_s26 = int_to_ptr.hbm [resolvable:$true] %s112_s26 }
   0xf   : > { %s1477_s27 = smov [#allocation6]   ;;  %s1478_s29 = smov [#allocation2]  }
  0x10   : > { %p1254_p11 = pneg %p91_p10  ;;  %s114_s28 = sshll.u32 %s1477_s27, 4  ;;  %s115_s28 = int_to_ptr.vmem [resolvable:$true] %s114_s28 }
  0x11   : > { %127 = sbr.rel (%p91_p10) target bundleno = 971 (0x3cb), region = 28 }
  0x12   : > { %p1255_p12 = pnand %p1265_p9, %p1254_p11 }
  0x14   : > { %1257 = dma.hbm_to_smem (!%p1255_p12), %s103_s23, 64, %s1478_s29, [#allocation5]  }
  0x15   : > { %1260 = dma.hbm_to_vmem [thread:$0]  (!%p1255_p12), %s113_s26, 128, %s115_s28, [#allocation3]  }
  0x16   : > { %1450 = dma.done.wait (%p1265_p9), [#allocation5], 64  }
  0x17   : > { %1452 = vsyncadd (%p1265_p9), [#allocation5], 4294967232 }
  0x18   : > { %1454 = dma.done.wait (%p1265_p9), [#allocation3], 128  }
  0x19   : > { %1456 = vsyncadd (%p1265_p9), [#allocation3], 4294967168 }
  0x1a   : > { %139 = sfence }
  0x1b   : > { %s1570_s30 = sshll.u32 %s1525_s13, 7  ;;  %v163_v0 = vld [vmem:[#allocation6] sm:$0xff]  ;;  %v1479_v14 = vmov 683565275   ;;  %v1480_v16 = vmov 2475754826  }
  0x1c   : > { %s152_s3 = sld [smem:[#allocation2 + %s1570_s30]]  ;;  %v1481_v18 = vmov 2131351028   ;;  %v1482_v20 = vmov 2102212464   ;;  %s161_s4 = sadd.s32 5, %s1570_s30 }
  0x1d   : > { %v1483_v22 = vmov 920167782   ;;  %v1484_v28 = vmov 1326507024   ;;  %s157_s5 = sadd.s32 3, %s1570_s30  ;;  %s159_s6 = sadd.s32 4, %s1570_s30 }
  0x1e   : > { %s1621_s7 = sld [smem:[#allocation2 + %s161_s4]]  ;;  %s478_s16 = sadd.s32 6, %s1570_s30 }
  0x1f   : > { %s1623_s8 = sld [smem:[#allocation2 + %s157_s5]]  ;;  %s480_s17 = sadd.s32 7, %s1570_s30 }
  0x20   : > { %s1625_s14 = sld [smem:[#allocation2 + %s159_s6]]  ;;  %s486_s23 = sadd.s32 10, %s1570_s30 }
  0x21   : > { %s479_s21 = sld [smem:[#allocation2 + %s478_s16]]  ;;  %s482_s25 = sadd.s32 8, %s1570_s30 }
  0x22   : > { %v164_v1 = vstv %s152_s3  ;;  %s481_s22 = sld [smem:[#allocation2 + %s480_s17]]  ;;  %s484_s27 = sadd.s32 9, %s1570_s30 }
  0x23   : > { %v1573_v2 = vadd.f32 %v164_v1, %v163_v0  ;;  %s487_s24 = sld [smem:[#allocation2 + %s486_s23]]  ;;  %s587_s29 = sadd.s32 11, %s1570_s30 }
  0x24   : > { %s1657_s26 = sld [smem:[#allocation2 + %s482_s25]]  ;;  %s589_s3 = sadd.s32 12, %s1570_s30 }
  0x25   : > { %v169_v3 = vand.u32 2139095040, %v1573_v2  ;;  %v166_v5 = vand.u32 2147483647, %v1573_v2  ;;  %vm168_vm12 = vcmp.lt.s32.totalorder %v1573_v2, 0  ;;  %s1665_s28 = sld [smem:[#allocation2 + %s484_s27]]  ;;  %s595_s6 = sadd.s32 15, %s1570_s30 }
  0x26   : > { %s588_s4 = sld [smem:[#allocation2 + %s587_s29]]  ;;  %s593_s16 = sadd.s32 14, %s1570_s30 }
  0x27   : > { %v170_v4 = vshrl.u32 %v169_v3, 23  ;;  %v173_v8 = vand.u32 8388607, %v166_v5  ;;  %v1485_v3 = vmov 0   ;;  %vm167_vm13 = vcmp.le.f32.partialorder %v166_v5, 0.7853982 }
  0x28   : > { %s590_s5 = sld [smem:[#allocation2 + %s589_s3]]  ;;  %s700_s25 = sadd.s32 20, %s1570_s30 }
  0x29   : > { %v1221_v6 = vadd.s32 4294967169, %v170_v4  ;;  %v174_v11 = vor.u32 8388608, %v173_v8  ;;  %s1708_s17 = sld [smem:[#allocation2 + %s593_s16]]  ;;  %s696_s27 = sadd.s32 18, %s1570_s30 }
  0x2a   : > { %s698_s29 = sadd.s32 19, %s1570_s30  ;;  %s803_s16 = sadd.s32 23, %s1570_s30 }
  0x2b   : > { %v176_v7 = vadd.s32 1, %v1221_v6  ;;  %v1582_v30 = vshll.u32 %v174_v11, 8  ;;  %s1756_s3 = sld [smem:[#allocation2 + %s698_s29]]  ;;  %s910_s29 = sadd.s32 28, %s1570_s30 }
  0x2d   : > { %vm177_vm0 = vcmp.gt.s32.totalorder %v176_v7, 0  ;;  %v215_v42 = vand.u32 65535, %v1582_v30  ;;  %v216_v43 = vshrl.u32 %v1582_v30, 16 }
  0x2e   : > { %v178_v9 = vsel %vm177_vm0, %v176_v7, 0 }
  0x2f   : > { %v180_v10 = vand.u32 31, %v178_v9  ;;  %v1579_v12 = vshrl.u32 %v178_v9, 5 }
  0x31   : > { %v181_v13 = vsub.s32 32, %v180_v10  ;;  %v183_v15 = vshll.u32 %v1479_v14, %v180_v10  ;;  %v186_v17 = vshll.u32 %v1480_v16, %v180_v10  ;;  %v189_v19 = vshll.u32 %v1481_v18, %v180_v10 }
  0x32   : > { %v192_v21 = vshll.u32 %v1482_v20, %v180_v10  ;;  %v195_v23 = vshll.u32 %v1483_v22, %v180_v10  ;;  %vm198_vm1 = vcmp.lt.s32.totalorder %v1579_v12, 1  ;;  %vm201_vm2 = vcmp.lt.s32.totalorder %v1579_v12, 4 }
  0x33   : > { %v184_v24 = vshrl.u32 %v1480_v16, %v181_v13  ;;  %v187_v25 = vshrl.u32 %v1481_v18, %v181_v13  ;;  %v190_v26 = vshrl.u32 %v1482_v20, %v181_v13  ;;  %v193_v27 = vshrl.u32 %v1483_v22, %v181_v13 }
  0x34   : > { %v196_v29 = vshrl.u32 %v1484_v28, %v181_v13  ;;  %vm200_vm3 = vcmp.lt.s32.totalorder %v1579_v12, 3  ;;  %vm199_vm4 = vcmp.lt.s32.totalorder %v1579_v12, 2  ;;  %v182_v50 = vshrl.u32 %v1479_v14, %v181_v13 }
  0x35   : > { %v185_v31 = vor.u32 %v184_v24, %v183_v15  ;;  %v188_v32 = vor.u32 %v187_v25, %v186_v17  ;;  %v191_v33 = vor.u32 %v190_v26, %v189_v19  ;;  %v194_v34 = vor.u32 %v193_v27, %v192_v21 }
  0x36   : > { %v197_v35 = vor.u32 %v196_v29, %v195_v23 }
  0x37   : > { %v206_v36 = vsel %vm198_vm1, %v185_v31, %v188_v32  ;;  %v210_v37 = vsel %vm198_vm1, %v188_v32, %v191_v33  ;;  %v207_v38 = vsel %vm201_vm2, %v194_v34, 920167782  ;;  %v202_v63 = vsel %vm198_vm1, %v182_v50, %v185_v31 }
  0x38   : > { %v211_v39 = vsel %vm201_vm2, %v197_v35, 1326507024  ;;  %v208_v40 = vsel %vm200_vm3, %v191_v33, %v207_v38  ;;  %v203_v1 = vsel %vm201_vm2, %v191_v33, 2102212464 }
  0x39   : > { %v212_v41 = vsel %vm200_vm3, %v194_v34, %v211_v39  ;;  %v209_v44 = vsel %vm199_vm4, %v206_v36, %v208_v40  ;;  %v204_v14 = vsel %vm200_vm3, %v188_v32, %v203_v1 }
  0x3a   : > { %v213_v45 = vsel %vm199_vm4, %v210_v37, %v212_v41  ;;  %v239_v48 = vand.u32 65535, %v209_v44  ;;  %v240_v49 = vshrl.u32 %v209_v44, 16  ;;  %v205_v22 = vsel %vm199_vm4, %v202_v63, %v204_v14 }
  0x3b   : > { %v217_v46 = vand.u32 65535, %v213_v45  ;;  %v218_v47 = vshrl.u32 %v213_v45, 16  ;;  %v259_v26 = vmul.u32 %v1582_v30, %v205_v22  ;;  %vm309_vm4 = vweird.f32 %v1573_v2 }
  0x3c   : > { %v241_v54 = vmul.u32 %v239_v48, %v215_v42  ;;  %v242_v55 = vmul.u32 %v240_v49, %v215_v42  ;;  %v243_v56 = vmul.u32 %v239_v48, %v216_v43  ;;  %v244_v60 = vmul.u32 %v240_v49, %v216_v43 }
  0x3d   : > { %v219_v51 = vmul.u32 %v217_v46, %v215_v42  ;;  %v220_v52 = vmul.u32 %v218_v47, %v215_v42  ;;  %v221_v53 = vmul.u32 %v217_v46, %v216_v43  ;;  %v222_v57 = vmul.u32 %v218_v47, %v216_v43 }
  0x3e   : > { %v245_v61 = vshll.u32 %v242_v55, 16  ;;  %v247_v62 = vshll.u32 %v243_v56, 16  ;;  %v246_v11 = vshrl.u32 %v242_v55, 16  ;;  %v248_v18 = vshrl.u32 %v243_v56, 16 }
  0x3f   : > { %v223_v58 = vshll.u32 %v220_v52, 16  ;;  %v225_v59 = vshll.u32 %v221_v53, 16  ;;  %v224_v7 = vshrl.u32 %v220_v52, 16  ;;  %v226_v15 = vshrl.u32 %v221_v53, 16 }
  0x40   : > { %vm249_vm6 = vc.u32 %v241_v54, %v245_v61  ;;  %v251_v6 = vadd.s32 %v245_v61, %v241_v54  ;;  %v488_v22 = vstv %s1623_s8  ;;  %s591_s8 = sadd.s32 13, %s1570_s30 }
  0x41   : > { %vm227_vm5 = vc.u32 %v219_v51, %v223_v58  ;;  %v229_v0 = vadd.s32 %v223_v58, %v219_v51  ;;  %v250_v9 = vsel %vm249_vm6, 1, %v1485_v3 }
  0x42   : > { %v228_v4 = vsel %vm227_vm5, 1, %v1485_v3  ;;  %v252_v13 = vadd.s32 %v250_v9, %v244_v60  ;;  %vm253_vm8 = vc.u32 %v251_v6, %v247_v62  ;;  %v255_v21 = vadd.s32 %v251_v6, %v247_v62 }
  0x43   : > { %v230_v8 = vadd.s32 %v228_v4, %v222_v57  ;;  %vm231_vm7 = vc.u32 %v229_v0, %v225_v59  ;;  %v254_v17 = vsel %vm253_vm8, 1, %v1485_v3 }
  0x44   : > { %v232_v10 = vsel %vm231_vm7, 1, %v1485_v3  ;;  %v256_v19 = vadd.s32 %v254_v17, %v252_v13 }
  0x45   : > { %v234_v16 = vadd.s32 %v232_v10, %v230_v8 }
  0x46   : > { %v257_v23 = vadd.s32 %v256_v19, %v246_v11 }
  0x47   : > { %v235_v20 = vadd.s32 %v234_v16, %v224_v7  ;;  %v320_v16 = vstv %s1621_s7  ;;  %s596_s7 = sld [smem:[#allocation2 + %s595_s6]] }
  0x48   : > { %v258_v25 = vadd.s32 %v257_v23, %v248_v18  ;;  %v490_v23 = vstv %s1625_s14  ;;  %s592_s14 = sld [smem:[#allocation2 + %s591_s8]]  ;;  %s807_s8 = sadd.s32 25, %s1570_s30 }
  0x49   : > { %v236_v24 = vadd.s32 %v235_v20, %v226_v15 }
  0x4a   : > { %v262_v27 = vadd.s32 1, %v258_v25 }
  0x4b   : > { %vm261_vm9 = vc.u32 %v236_v24, %v255_v21  ;;  %v260_v12 = vadd.s32 %v255_v21, %v236_v24 }
  0x4c   : > { %v263_v28 = vsel %vm261_vm9, %v262_v27, %v258_v25 }
  0x4d   : > { %v264_v29 = vadd.s32 %v263_v28, %v259_v26 }
  0x4f   : > { %v265_v31 = vadd.s32 536870912, %v264_v29 }
  0x51   : > { %v266_v32 = vshrl.u32 %v265_v31, 30  ;;  %v497_v31 = vstv %s481_s22  ;;  %s694_s22 = sadd.s32 17, %s1570_s30 }
  0x53   : > { %v267_v33 = vshll.u32 %v266_v32, 30  ;;  %v290_v50 = vsub.s32 4, %v266_v32 }
  0x55   : > { %v268_v34 = vsub.s32 %v264_v29, %v267_v33  ;;  %v291_v53 = vsel %vm168_vm12, %v290_v50, %v266_v32  ;;  %v495_v29 = vstv %s479_s21  ;;  %s692_s21 = sadd.s32 16, %s1570_s30 }
  0x56   : > { %v293_v56 = vsel %vm167_vm13, 0, %v291_v53  ;;  %s693_s23 = sld [smem:[#allocation2 + %s692_s21]]  ;;  %s805_s21 = sadd.s32 24, %s1570_s30 }
  0x57   : > { %vm269_vm10 = vcmp.lt.s32.totalorder %v268_v34, 0  ;;  %v270_v35 = vsub.s32 0, %v268_v34  ;;  %v466_v61 = vadd.s32 3, %v293_v56  ;;  %v310_v1 = vand.u32 3, %v293_v56 }
  0x59   : > { %v271_v36 = vsel %vm269_vm10, %v270_v35, %v268_v34  ;;  %v467_v3 = vand.u32 3, %v466_v61  ;;  %vm315_vm14 = vcmp.eq.s32.totalorder %v310_v1, 2  ;;  %vm311_vm0 = vcmp.lt.s32.totalorder %v310_v1, 2 }
  0x5a   : > { %v272_v37 = vclz %v271_v36  ;;  %vm312_vm1 = vcmp.eq.s32.totalorder %v310_v1, 0 }
  0x5b   : > { %vm472_vm15 = vcmp.eq.s32.totalorder %v467_v3, 2  ;;  %vm469_vm2 = vcmp.eq.s32.totalorder %v467_v3, 0  ;;  %vm468_vm3 = vcmp.lt.s32.totalorder %v467_v3, 2 }
  0x5c   : > { %v1222_v38 = vadd.s32 4294967294, %v272_v37 }
  0x5e   : > { %vm1223_vm11 = vcmp.lt.s32.totalorder %v1222_v38, 0 }
  0x5f   : > { %v275_v39 = vsel %vm1223_vm11, 0, %v1222_v38 }
  0x60   : > { %v276_v40 = vsub.s32 32, %v275_v39  ;;  %v277_v41 = vshll.u32 %v268_v34, %v275_v39  ;;  %v280_v42 = vsub.s32 4294967266, %v275_v39 }
  0x62   : > { %v278_v30 = vshrl.u32 %v260_v12, %v276_v40  ;;  %v281_v43 = vadd.s32 127, %v280_v42 }
  0x64   : > { %v279_v44 = vor.u32 %v278_v30, %v277_v41  ;;  %v282_v45 = vshll.u32 %v281_v43, 23 }
  0x66   : > { %v283_v46 = vor.u32 4788187, %v282_v45  ;;  %v286_v47 = vcvt.s32.f32 %v279_v44 }
  0x68   : > { %v284_v48 = vand.u32 2147483647, %v283_v46 }
  0x6a   : > { %v287_v49 = vmul.f32 %v286_v47, %v284_v48  ;;  %v512_v47 = vstv %s487_s24  ;;  %s695_s24 = sld [smem:[#allocation2 + %s694_s22]] }
  0x6b   : > { %s1807_s22 = sld [smem:[#allocation2 + %s805_s21]] }
  0x6c   : > { %v288_v51 = vxor.u32 2147483648, %v287_v49 }
  0x6e   : > { %v289_v52 = vsel %vm168_vm12, %v288_v51, %v287_v49 }
  0x6f   : > { %v292_v54 = vsel %vm167_vm13, %v1573_v2, %v289_v52 }
  0x70   : > { %v294_v55 = vmul.f32 %v292_v54, %v292_v54 }
  0x72   : > { %v295_v57 = vmul.f32 -0.001358992, %v294_v55  ;;  %v302_v58 = vmul.f32 -0.00019511016, %v294_v55 }
  0x74   : > { %v296_v59 = vadd.f32 0.041655596, %v295_v57  ;;  %v303_v60 = vadd.f32 0.008332121, %v302_v58 }
  0x76   : > { %v297_v62 = vmul.f32 %v296_v59, %v294_v55  ;;  %v304_v63 = vmul.f32 %v303_v60, %v294_v55 }
  0x78   : > { %v298_v0 = vadd.f32 -0.4999988, %v297_v62  ;;  %v305_v5 = vadd.f32 -0.16666654, %v304_v63 }
  0x7a   : > { %v299_v4 = vmul.f32 %v298_v0, %v294_v55  ;;  %v306_v6 = vmul.f32 %v305_v5, %v294_v55 }
  0x7c   : > { %v300_v7 = vadd.f32 1.0, %v299_v4  ;;  %v307_v8 = vadd.f32 1.0, %v306_v6 }
  0x7e   : > { %v308_v9 = vmul.f32 %v307_v8, %v292_v54  ;;  %v316_v10 = vxor.u32 2147483648, %v300_v7 }
  0x80   : > { %v313_v11 = vxor.u32 2147483648, %v308_v9  ;;  %v317_v13 = vsel %vm315_vm14, %v316_v10, %v308_v9  ;;  %v474_v14 = vsel %vm472_vm15, %v316_v10, %v308_v9 }
  0x82   : > { %v314_v15 = vsel %vm312_vm1, %v300_v7, %v313_v11  ;;  %v471_v17 = vsel %vm469_vm2, %v300_v7, %v313_v11 }
  0x83   : > { %v318_v18 = vsel %vm311_vm0, %v314_v15, %v317_v13  ;;  %v475_v19 = vsel %vm468_vm3, %v471_v17, %v474_v14 }
  0x84   : > { %v319_v20 = vsel %vm309_vm4, nan, %v318_v18  ;;  %v476_v21 = vsel %vm309_vm4, nan, %v475_v19  ;;  %v566_v19 = vstv %s1657_s26  ;;  %s701_s26 = sld [smem:[#allocation2 + %s700_s25]] }
  0x85   : > { %v1633_v24 = vmul.f32 %v320_v16, %v319_v20  ;;  %v1635_v25 = vmul.f32 %v476_v21, %v320_v16 }
  0x87   : > { %v1640_v26 = vsub.f32 %v1633_v24, %v488_v22  ;;  %v1645_v2 = vsub.f32 %v1635_v25, %v490_v23  ;;  %v571_v21 = vadd.f32 %v488_v22, %v1633_v24 }
  0x89   : > { %v492_v27 = vmul.f32 %v1640_v26, %v1640_v26  ;;  %v493_v28 = vmul.f32 %v1645_v2, %v1645_v2 }
  0x8b   : > { %v494_v32 = vadd.f32 %v493_v28, %v492_v27  ;;  %v579_v27 = vadd.f32 %v490_v23, %v1635_v25 }
  0x8d   : > { %v496_v33 = vsub.f32 %v495_v29, %v494_v32  ;;  %v498_v34 = vsub.f32 %v494_v32, %v497_v31  ;;  %1314 = vrsqrt.f32 %v494_v32  ;;  %vm534_vm5 = vcmp.gt.f32.partialorder %v494_v32, 0.0 }
  0x8e   : > { %v535_v38 = vsel %vm534_vm5, %v494_v32, 1.0  ;;  %vm507_vm6 = vcmp.eq.f32.partialorder %v494_v32, inf  ;;  %v510_v45 = vand.u32 2147483648, %v494_v32  ;;  %vm509_vm7 = vcmp.eq.f32.partialorder %v494_v32, 0.0 }
  0x8f   : > { %v499_v35 = vmul.f32 %v498_v34, %v496_v33  ;;  %vm541_vm8 = vweird.f32 %v535_v38  ;;  %v547_v60 = vand.u32 2147483648, %v535_v38  ;;  %v545_v62 = vand.u32 2147483647, %v535_v38 }
  0x90   : > { %v572_v33 = vmul.f32 0.5, %v571_v21  ;;  %v580_v34 = vmul.f32 0.5, %v579_v27 }
  0x91   : > { %v1651_v36 = vmax.f32 %v499_v35, 0.0  ;;  %v548_v0 = vor.u32 1.1754944e-38, %v547_v60  ;;  %vm546_vm11 = vcmp.eq.f32.partialorder %v545_v62, 8.507059e+37  ;;  %v517_v14 = vmul.f32 0.25, %v499_v35 }
  0x93   : > { %v1315_v37 = vpop.eup %1314  ;;  %1316 = vrsqrt.f32 %v1651_v36  ;;  %vm559_vm12 = vcmp.eq.f32.partialorder %v1651_v36, inf  ;;  %v562_v8 = vand.u32 2147483648, %v1651_v36  ;;  %vm561_vm15 = vcmp.eq.f32.partialorder %v1651_v36, 0.0 }
  0x94   : > { %v501_v12 = vmul.f32 %v1315_v37, %v494_v32  ;;  %1318 = vrcp.f32 %v535_v38 }
  0x96   : > { %v502_v39 = vmul.f32 %v1315_v37, %v501_v12 }
  0x98   : > { %v503_v40 = vmul.f32 0.5, %v502_v39 }
  0x99   : > { %v1317_v41 = vpop.eup %1316 }
  0x9a   : > { %v504_v42 = vsub.f32 1.5, %v503_v40  ;;  %v1319_v30 = vpop.eup %1318  ;;  %v553_v44 = vmul.f32 %v1317_v41, %v1651_v36 }
  0x9b   : > { %v537_v48 = vmul.f32 %v1319_v30, %v535_v38  ;;  %vm542_vm9 = vweird.f32 %v1319_v30 }
  0x9c   : > { %v505_v43 = vmul.f32 %v1315_v37, %v504_v42  ;;  %v554_v50 = vmul.f32 %v1317_v41, %v553_v44  ;;  %vm543_vm10 = vmor %vm541_vm8, %vm542_vm9 }
  0x9d   : > { %v538_v53 = vsub.f32 1.0, %v537_v48 }
  0x9e   : > { %v506_v46 = vmul.f32 %v505_v43, %v494_v32  ;;  %v555_v55 = vmul.f32 0.5, %v554_v50 }
  0x9f   : > { %v539_v57 = vmul.f32 %v1319_v30, %v538_v53 }
  0xa0   : > { %v508_v49 = vsel %vm507_vm6, %v494_v32, %v506_v46  ;;  %v556_v59 = vsub.f32 1.5, %v555_v55  ;;  %v600_v46 = vstv %s588_s4  ;;  %s799_s4 = sadd.s32 21, %s1570_s30 }
  0xa1   : > { %v511_v51 = vsel %vm509_vm7, %v510_v45, %v508_v49  ;;  %v540_v61 = vadd.f32 %v1319_v30, %v539_v57  ;;  %s800_s6 = sld [smem:[#allocation2 + %s799_s4]]  ;;  %s912_s4 = sadd.s32 29, %s1570_s30 }
  0xa2   : > { %v513_v52 = vadd.f32 %v512_v47, %v511_v51  ;;  %v557_v63 = vmul.f32 %v1317_v41, %v556_v59  ;;  %v602_v47 = vstv %s590_s5  ;;  %s801_s5 = sadd.s32 22, %s1570_s30 }
  0xa3   : > { %v544_v5 = vsel %vm543_vm10, %v1319_v30, %v540_v61 }
  0xa4   : > { %v514_v54 = vmul.f32 0.33333334, %v513_v52  ;;  %v558_v3 = vmul.f32 %v557_v63, %v1651_v36  ;;  %v549_v7 = vsel %vm546_vm11, %v548_v0, %v544_v5  ;;  %v617_v63 = vstv %s596_s7  ;;  %s802_s7 = sld [smem:[#allocation2 + %s801_s5]]  ;;  %s153_s5 = sadd.s32 1, %s1570_s30 }
  0xa5   : > { %v550_v16 = vmul.f32 0.5, %v549_v7 }
  0xa6   : > { %v515_v56 = vmul.f32 %v514_v54, %v514_v54  ;;  %v560_v11 = vsel %vm559_vm12, %v1651_v36, %v558_v3  ;;  %v576_v36 = vstv %s1665_s28  ;;  %s1748_s28 = sld [smem:[#allocation2 + %s696_s27]]  ;;  %s914_s27 = sadd.s32 30, %s1570_s30 }
  0xa7   : > { %v563_v18 = vsel %vm561_vm15, %v562_v8, %v560_v11  ;;  %v567_v31 = vmul.f32 %v566_v19, %v550_v16 }
  0xa8   : > { %v516_v58 = vmul.f32 %v515_v56, %v515_v56  ;;  %v564_v29 = vmul.f32 %v563_v18, %v550_v16 }
  0xaa   : > { %1320 = vrcp.f32 %v516_v58  ;;  %v529_v6 = vand.u32 2147483648, %v516_v58  ;;  %vm523_vm13 = vweird.f32 %v516_v58  ;;  %v527_v10 = vand.u32 2147483647, %v516_v58 }
  0xac   : > { %v530_v15 = vor.u32 1.1754944e-38, %v529_v6  ;;  %vm528_vm1 = vcmp.eq.f32.partialorder %v527_v10, 8.507059e+37 }
  0xb0   : > { %v1321_v1 = vpop.eup %1320 }
  0xb1   : > { %v519_v4 = vmul.f32 %v1321_v1, %v516_v58  ;;  %vm524_vm14 = vweird.f32 %v1321_v1 }
  0xb2   : > { %vm525_vm0 = vmor %vm523_vm13, %vm524_vm14 }
  0xb3   : > { %v520_v9 = vsub.f32 1.0, %v519_v4 }
  0xb5   : > { %v521_v13 = vmul.f32 %v1321_v1, %v520_v9 }
  0xb7   : > { %v522_v17 = vadd.f32 %v1321_v1, %v521_v13 }
  0xb9   : > { %v526_v20 = vsel %vm525_vm0, %v1321_v1, %v522_v17 }
  0xba   : > { %v531_v28 = vsel %vm528_vm1, %v530_v15, %v526_v20 }
  0xbb   : > { %v1675_v32 = vmul.f32 %v531_v28, %v517_v14 }
  0xbd   : > { %vm533_vm2 = vcmp.ge.f32.partialorder %v1675_v32, 0.0001 }
  0xbe   : > { %v565_v35 = vsel %vm533_vm2, %v564_v29, 0.0  ;;  %v568_v22 = vsel %vm533_vm2, %v567_v31, 0.0 }
  0xbf   : > { %v573_v23 = vmul.f32 %v568_v22, %v1640_v26  ;;  %v575_v37 = vmul.f32 %v565_v35, %v1645_v2  ;;  %v581_v38 = vmul.f32 %v568_v22, %v1645_v2  ;;  %v583_v12 = vmul.f32 %v565_v35, %v1640_v26 }
  0xc1   : > { %v574_v39 = vadd.f32 %v573_v23, %v572_v33  ;;  %v577_v40 = vmul.f32 %v576_v36, %v575_v37  ;;  %v582_v41 = vadd.f32 %v581_v38, %v580_v34  ;;  %v584_v42 = vmul.f32 %v583_v12, %v576_v36 }
  0xc3   : > { %v1688_v30 = vsub.f32 %v574_v39, %v577_v40  ;;  %v1690_v43 = vadd.f32 %v584_v42, %v582_v41  ;;  %v671_v39 = vstv %s592_s14  ;;  %s808_s14 = sld [smem:[#allocation2 + %s807_s8]] }
  0xc4   : > { %s1867_s8 = sld [smem:[#allocation2 + %s153_s5]] }
  0xc5   : > { %v597_v44 = vmul.f32 %v1688_v30, %v1688_v30  ;;  %v598_v45 = vmul.f32 %v1690_v43, %v1690_v43 }
  0xc7   : > { %v599_v2 = vadd.f32 %v598_v45, %v597_v44 }
  0xc9   : > { %v601_v48 = vsub.f32 %v600_v46, %v599_v2  ;;  %v603_v26 = vsub.f32 %v599_v2, %v602_v47  ;;  %1322 = vrsqrt.f32 %v599_v2  ;;  %vm639_vm3 = vcmp.gt.f32.partialorder %v599_v2, 0.0 }
  0xca   : > { %v640_v52 = vsel %vm639_vm3, %v599_v2, 1.0  ;;  %vm612_vm4 = vcmp.eq.f32.partialorder %v599_v2, inf  ;;  %v615_v61 = vand.u32 2147483648, %v599_v2  ;;  %vm614_vm5 = vcmp.eq.f32.partialorder %v599_v2, 0.0 }
  0xcb   : > { %v604_v49 = vmul.f32 %v603_v26, %v601_v48  ;;  %vm646_vm6 = vweird.f32 %v640_v52  ;;  %v652_v14 = vand.u32 2147483648, %v640_v52  ;;  %v650_v16 = vand.u32 2147483647, %v640_v52 }
  0xcc   : > { %v677_v46 = vmul.f32 0.5, %v1688_v30  ;;  %v685_v47 = vmul.f32 0.5, %v1690_v43  ;;  %v681_v26 = vstv %s1708_s17  ;;  %s1799_s17 = sld [smem:[#allocation2 + %s803_s16]] }
  0xcd   : > { %v1696_v50 = vmax.f32 %v604_v49, 0.0  ;;  %v653_v18 = vor.u32 1.1754944e-38, %v652_v14  ;;  %vm651_vm9 = vcmp.eq.f32.partialorder %v650_v16, 8.507059e+37  ;;  %v622_v36 = vmul.f32 0.25, %v604_v49 }
  0xcf   : > { %v1323_v51 = vpop.eup %1322  ;;  %1324 = vrsqrt.f32 %v1696_v50  ;;  %vm664_vm10 = vcmp.eq.f32.partialorder %v1696_v50, inf  ;;  %v667_v31 = vand.u32 2147483648, %v1696_v50  ;;  %vm666_vm13 = vcmp.eq.f32.partialorder %v1696_v50, 0.0 }
  0xd0   : > { %v606_v53 = vmul.f32 %v1323_v51, %v599_v2  ;;  %1326 = vrcp.f32 %v640_v52 }
  0xd2   : > { %v607_v54 = vmul.f32 %v1323_v51, %v606_v53 }
  0xd4   : > { %v608_v55 = vmul.f32 0.5, %v607_v54 }
  0xd5   : > { %v1325_v56 = vpop.eup %1324 }
  0xd6   : > { %v609_v57 = vsub.f32 1.5, %v608_v55  ;;  %v1327_v58 = vpop.eup %1326  ;;  %v658_v60 = vmul.f32 %v1325_v56, %v1696_v50 }
  0xd7   : > { %v642_v0 = vmul.f32 %v1327_v58, %v640_v52  ;;  %vm647_vm7 = vweird.f32 %v1327_v58 }
  0xd8   : > { %v610_v59 = vmul.f32 %v1323_v51, %v609_v57  ;;  %v659_v1 = vmul.f32 %v1325_v56, %v658_v60  ;;  %vm648_vm8 = vmor %vm646_vm6, %vm647_vm7 }
  0xd9   : > { %v643_v6 = vsub.f32 1.0, %v642_v0  ;;  %v709_v0 = vstv %s695_s24  ;;  %s908_s24 = sadd.s32 27, %s1570_s30 }
  0xda   : > { %v611_v62 = vmul.f32 %v610_v59, %v599_v2  ;;  %v660_v8 = vmul.f32 0.5, %v659_v1 }
  0xdb   : > { %v644_v10 = vmul.f32 %v1327_v58, %v643_v6 }
  0xdc   : > { %v613_v5 = vsel %vm612_vm4, %v599_v2, %v611_v62  ;;  %v661_v13 = vsub.f32 1.5, %v660_v8 }
  0xdd   : > { %v616_v3 = vsel %vm614_vm5, %v615_v61, %v613_v5  ;;  %v645_v15 = vadd.f32 %v1327_v58, %v644_v10 }
  0xde   : > { %v618_v4 = vadd.f32 %v617_v63, %v616_v3  ;;  %v662_v17 = vmul.f32 %v1325_v56, %v661_v13  ;;  %v707_v63 = vstv %s693_s23  ;;  %s906_s23 = sadd.s32 26, %s1570_s30 }
  0xdf   : > { %v649_v19 = vsel %vm648_vm8, %v1327_v58, %v645_v15  ;;  %s907_s25 = sld [smem:[#allocation2 + %s906_s23]] }
  0xe0   : > { %v619_v7 = vmul.f32 0.33333334, %v618_v4  ;;  %v663_v21 = vmul.f32 %v662_v17, %v1696_v50  ;;  %v654_v29 = vsel %vm651_vm9, %v653_v18, %v649_v19 }
  0xe1   : > { %v655_v37 = vmul.f32 0.5, %v654_v29 }
  0xe2   : > { %v620_v9 = vmul.f32 %v619_v7, %v619_v7  ;;  %v665_v35 = vsel %vm664_vm10, %v1696_v50, %v663_v21 }
  0xe3   : > { %v668_v12 = vsel %vm666_vm13, %v667_v31, %v665_v35  ;;  %v672_v44 = vmul.f32 %v671_v39, %v655_v37 }
  0xe4   : > { %v621_v11 = vmul.f32 %v620_v9, %v620_v9  ;;  %v669_v42 = vmul.f32 %v668_v12, %v655_v37 }
  0xe6   : > { %1328 = vrcp.f32 %v621_v11  ;;  %v634_v28 = vand.u32 2147483648, %v621_v11  ;;  %vm628_vm11 = vweird.f32 %v621_v11  ;;  %v632_v34 = vand.u32 2147483647, %v621_v11 }
  0xe8   : > { %v635_v23 = vor.u32 1.1754944e-38, %v634_v28  ;;  %vm633_vm15 = vcmp.eq.f32.partialorder %v632_v34, 8.507059e+37 }
  0xec   : > { %v1329_v20 = vpop.eup %1328 }
  0xed   : > { %v624_v27 = vmul.f32 %v1329_v20, %v621_v11  ;;  %vm629_vm12 = vweird.f32 %v1329_v20 }
  0xee   : > { %vm630_vm14 = vmor %vm628_vm11, %vm629_vm12 }
  0xef   : > { %v625_v33 = vsub.f32 1.0, %v624_v27 }
  0xf1   : > { %v626_v22 = vmul.f32 %v1329_v20, %v625_v33 }
  0xf3   : > { %v627_v38 = vadd.f32 %v1329_v20, %v626_v22 }
  0xf5   : > { %v631_v40 = vsel %vm630_vm14, %v1329_v20, %v627_v38  ;;  %v724_v20 = vstv %s701_s26  ;;  %s909_s26 = sld [smem:[#allocation2 + %s908_s24]] }
  0xf6   : > { %v636_v41 = vsel %vm633_vm15, %v635_v23, %v631_v40 }
  0xf7   : > { %v1710_v45 = vmul.f32 %v636_v41, %v622_v36 }
  0xf9   : > { %vm638_vm0 = vcmp.ge.f32.partialorder %v1710_v45, 0.0001 }
  0xfa   : > { %v670_v2 = vsel %vm638_vm0, %v669_v42, 0.0  ;;  %v673_v48 = vsel %vm638_vm0, %v672_v44, 0.0 }
  0xfb   : > { %v678_v49 = vmul.f32 %v673_v48, %v1688_v30  ;;  %v680_v50 = vmul.f32 %v670_v2, %v1690_v43  ;;  %v686_v51 = vmul.f32 %v673_v48, %v1690_v43  ;;  %v688_v52 = vmul.f32 %v670_v2, %v1688_v30 }
  0xfd   : > { %v679_v53 = vadd.f32 %v678_v49, %v677_v46  ;;  %v682_v54 = vmul.f32 %v681_v26, %v680_v50  ;;  %v687_v55 = vadd.f32 %v686_v51, %v685_v47  ;;  %v689_v56 = vmul.f32 %v688_v52, %v681_v26 }
  0xff   : > { %v1726_v57 = vsub.f32 %v679_v53, %v682_v54  ;;  %v1728_v58 = vadd.f32 %v689_v56, %v687_v55 }
 0x101   : > { %v1732_v59 = vsub.f32 %v1726_v57, %v1688_v30  ;;  %v1736_v60 = vsub.f32 %v1728_v58, %v1690_v43 }
 0x103   : > { %v704_v61 = vmul.f32 %v1732_v59, %v1732_v59  ;;  %v705_v62 = vmul.f32 %v1736_v60, %v1736_v60 }
 0x105   : > { %v706_v5 = vadd.f32 %v705_v62, %v704_v61  ;;  %v778_v62 = vstv %s1748_s28  ;;  %s915_s28 = sld [smem:[#allocation2 + %s914_s27]] }
 0x107   : > { %v708_v1 = vsub.f32 %v707_v63, %v706_v5  ;;  %v710_v3 = vsub.f32 %v706_v5, %v709_v0  ;;  %1330 = vrsqrt.f32 %v706_v5  ;;  %vm746_vm1 = vcmp.gt.f32.partialorder %v706_v5, 0.0 }
 0x108   : > { %v747_v8 = vsel %vm746_vm1, %v706_v5, 1.0  ;;  %vm719_vm3 = vcmp.eq.f32.partialorder %v706_v5, inf  ;;  %v722_v18 = vand.u32 2147483648, %v706_v5  ;;  %vm721_vm4 = vcmp.eq.f32.partialorder %v706_v5, 0.0 }
 0x109   : > { %v711_v4 = vmul.f32 %v710_v3, %v708_v1  ;;  %vm753_vm5 = vweird.f32 %v747_v8  ;;  %v759_v38 = vand.u32 2147483648, %v747_v8  ;;  %v757_v39 = vand.u32 2147483647, %v747_v8 }
 0x10a   : > { %v783_v0 = vadd.f32 %v1726_v57, %v1688_v30 }
 0x10b   : > { %v1742_v6 = vmax.f32 %v711_v4, 0.0  ;;  %v760_v41 = vor.u32 1.1754944e-38, %v759_v38  ;;  %vm758_vm8 = vcmp.eq.f32.partialorder %v757_v39, 8.507059e+37  ;;  %v729_v53 = vmul.f32 0.25, %v711_v4 }
 0x10d   : > { %v1331_v7 = vpop.eup %1330  ;;  %1332 = vrsqrt.f32 %v1742_v6  ;;  %vm771_vm9 = vcmp.eq.f32.partialorder %v1742_v6, inf  ;;  %v774_v26 = vand.u32 2147483648, %v1742_v6  ;;  %vm773_vm12 = vcmp.eq.f32.partialorder %v1742_v6, 0.0 }
 0x10e   : > { %v713_v9 = vmul.f32 %v1331_v7, %v706_v5  ;;  %1334 = vrcp.f32 %v747_v8 }
 0x110   : > { %v714_v10 = vmul.f32 %v1331_v7, %v713_v9 }
 0x112   : > { %v715_v11 = vmul.f32 0.5, %v714_v10  ;;  %v788_v10 = vstv %s1756_s3  ;;  %s1853_s3 = sld [smem:[#allocation2 + %s910_s29]] }
 0x113   : > { %v1333_v13 = vpop.eup %1332 }
 0x114   : > { %v716_v14 = vsub.f32 1.5, %v715_v11  ;;  %v1335_v15 = vpop.eup %1334  ;;  %v765_v17 = vmul.f32 %v1333_v13, %v1742_v6 }
 0x115   : > { %v749_v21 = vmul.f32 %v1335_v15, %v747_v8  ;;  %vm754_vm6 = vweird.f32 %v1335_v15 }
 0x116   : > { %v717_v16 = vmul.f32 %v1331_v7, %v716_v14  ;;  %v766_v28 = vmul.f32 %v1333_v13, %v765_v17  ;;  %vm755_vm7 = vmor %vm753_vm5, %vm754_vm6  ;;  %v784_v7 = vmul.f32 0.5, %v783_v0 }
 0x117   : > { %v750_v33 = vsub.f32 1.0, %v749_v21 }
 0x118   : > { %v718_v19 = vmul.f32 %v717_v16, %v706_v5  ;;  %v767_v35 = vmul.f32 0.5, %v766_v28  ;;  %v814_v28 = vstv %s800_s6  ;;  %s1862_s6 = sld [smem:[#allocation2 + %s912_s4]]  ;;  %s1243_s4 = smul.u32 24, %s1525_s13 }
 0x119   : > { %v751_v36 = vmul.f32 %v1335_v15, %v750_v33 }
 0x11a   : > { %v720_v27 = vsel %vm719_vm3, %v706_v5, %v718_v19  ;;  %v768_v37 = vsub.f32 1.5, %v767_v35  ;;  %v791_v5 = vadd.f32 %v1728_v58, %v1690_v43 }
 0x11b   : > { %v723_v29 = vsel %vm721_vm4, %v722_v18, %v720_v27  ;;  %v752_v12 = vadd.f32 %v1335_v15, %v751_v36 }
 0x11c   : > { %v725_v31 = vadd.f32 %v724_v20, %v723_v29  ;;  %v769_v40 = vmul.f32 %v1333_v13, %v768_v37  ;;  %v792_v8 = vmul.f32 0.5, %v791_v5  ;;  %v816_v29 = vstv %s802_s7  ;;  %s155_s7 = sadd.s32 2, %s1570_s30 }
 0x11d   : > { %v756_v42 = vsel %vm755_vm7, %v1335_v15, %v752_v12 }
 0x11e   : > { %v726_v34 = vmul.f32 0.33333334, %v725_v31  ;;  %v770_v46 = vmul.f32 %v769_v40, %v1742_v6  ;;  %v761_v48 = vsel %vm758_vm8, %v760_v41, %v756_v42 }
 0x11f   : > { %v762_v55 = vmul.f32 0.5, %v761_v48 }
 0x120   : > { %v727_v22 = vmul.f32 %v726_v34, %v726_v34  ;;  %v772_v51 = vsel %vm771_vm9, %v1742_v6, %v770_v46 }
 0x121   : > { %v775_v61 = vsel %vm773_vm12, %v774_v26, %v772_v51  ;;  %v779_v6 = vmul.f32 %v778_v62, %v762_v55 }
 0x122   : > { %v728_v23 = vmul.f32 %v727_v22, %v727_v22  ;;  %v776_v3 = vmul.f32 %v775_v61, %v762_v55 }
 0x124   : > { %1336 = vrcp.f32 %v728_v23  ;;  %v741_v2 = vand.u32 2147483648, %v728_v23  ;;  %vm735_vm10 = vweird.f32 %v728_v23  ;;  %v739_v50 = vand.u32 2147483647, %v728_v23 }
 0x126   : > { %v742_v54 = vor.u32 1.1754944e-38, %v741_v2  ;;  %vm740_vm14 = vcmp.eq.f32.partialorder %v739_v50, 8.507059e+37  ;;  %v831_v2 = vstv %s808_s14  ;;  %s156_s14 = sld [smem:[#allocation2 + %s155_s7]]  ;;  %s1135_s7 = scalar_lea.hbm %s1949_s2, %s1243_s4 }
 0x12a   : > { %v1337_v44 = vpop.eup %1336 }
 0x12b   : > { %v731_v47 = vmul.f32 %v1337_v44, %v728_v23  ;;  %vm736_vm11 = vweird.f32 %v1337_v44 }
 0x12c   : > { %vm737_vm13 = vmor %vm735_vm10, %vm736_vm11 }
 0x12d   : > { %v732_v49 = vsub.f32 1.0, %v731_v47 }
 0x12f   : > { %v733_v52 = vmul.f32 %v1337_v44, %v732_v49 }
 0x131   : > { %v734_v56 = vadd.f32 %v1337_v44, %v733_v52 }
 0x133   : > { %v738_v63 = vsel %vm737_vm13, %v1337_v44, %v734_v56 }
 0x134   : > { %v743_v1 = vsel %vm740_vm14, %v742_v54, %v738_v63 }
 0x135   : > { %v1763_v4 = vmul.f32 %v743_v1, %v729_v53 }
 0x137   : > { %vm745_vm15 = vcmp.ge.f32.partialorder %v1763_v4, 0.0001 }
 0x138   : > { %v777_v9 = vsel %vm745_vm15, %v776_v3, 0.0  ;;  %v780_v30 = vsel %vm745_vm15, %v779_v6, 0.0 }
 0x139   : > { %v785_v43 = vmul.f32 %v780_v30, %v1732_v59  ;;  %v787_v11 = vmul.f32 %v777_v9, %v1736_v60  ;;  %v793_v13 = vmul.f32 %v780_v30, %v1736_v60  ;;  %v795_v14 = vmul.f32 %v777_v9, %v1732_v59 }
 0x13b   : > { %v786_v15 = vadd.f32 %v785_v43, %v784_v7  ;;  %v789_v16 = vmul.f32 %v788_v10, %v787_v11  ;;  %v794_v17 = vadd.f32 %v793_v13, %v792_v8  ;;  %v796_v18 = vmul.f32 %v795_v14, %v788_v10 }
 0x13d   : > { %v1777_v19 = vsub.f32 %v786_v15, %v789_v16  ;;  %v1779_v20 = vadd.f32 %v796_v18, %v794_v17 }
 0x13f   : > { %v1783_v21 = vsub.f32 %v1777_v19, %v1633_v24  ;;  %v1787_v60 = vsub.f32 %v1779_v20, %v1635_v25 }
 0x141   : > { %v811_v59 = vmul.f32 %v1783_v21, %v1783_v21  ;;  %v812_v27 = vmul.f32 %v1787_v60, %v1787_v60 }
 0x143   : > { %v813_v31 = vadd.f32 %v812_v27, %v811_v59 }
 0x145   : > { %v815_v33 = vsub.f32 %v814_v28, %v813_v31  ;;  %v817_v34 = vsub.f32 %v813_v31, %v816_v29  ;;  %1338 = vrsqrt.f32 %v813_v31  ;;  %vm853_vm1 = vcmp.gt.f32.partialorder %v813_v31, 0.0 }
 0x146   : > { %v854_v23 = vsel %vm853_vm1, %v813_v31, 1.0  ;;  %vm826_vm3 = vcmp.eq.f32.partialorder %v813_v31, inf  ;;  %v829_v46 = vand.u32 2147483648, %v813_v31  ;;  %vm828_vm4 = vcmp.eq.f32.partialorder %v813_v31, 0.0 }
 0x147   : > { %v818_v35 = vmul.f32 %v817_v34, %v815_v33  ;;  %vm860_vm5 = vweird.f32 %v854_v23  ;;  %v866_v63 = vand.u32 2147483648, %v854_v23  ;;  %v864_v5 = vand.u32 2147483647, %v854_v23 }
 0x148   : > { %v885_v28 = vstv %s1799_s17  ;;  %v898_v33 = vadd.f32 %v1779_v20, %v1635_v25 }
 0x149   : > { %v1793_v22 = vmax.f32 %v818_v35, 0.0  ;;  %v867_v3 = vor.u32 1.1754944e-38, %v866_v63  ;;  %vm865_vm8 = vcmp.eq.f32.partialorder %v864_v5, 8.507059e+37  ;;  %v836_v16 = vmul.f32 0.25, %v818_v35 }
 0x14b   : > { %v1339_v36 = vpop.eup %1338  ;;  %1340 = vrsqrt.f32 %v1793_v22  ;;  %vm878_vm9 = vcmp.eq.f32.partialorder %v1793_v22, inf  ;;  %v881_v43 = vand.u32 2147483648, %v1793_v22  ;;  %vm880_vm12 = vcmp.eq.f32.partialorder %v1793_v22, 0.0 }
 0x14c   : > { %v820_v37 = vmul.f32 %v1339_v36, %v813_v31  ;;  %1342 = vrcp.f32 %v854_v23 }
 0x14e   : > { %v821_v38 = vmul.f32 %v1339_v36, %v820_v37  ;;  %v899_v37 = vmul.f32 0.5, %v898_v33 }
 0x150   : > { %v822_v12 = vmul.f32 0.5, %v821_v38 }
 0x151   : > { %v1341_v39 = vpop.eup %1340 }
 0x152   : > { %v823_v40 = vsub.f32 1.5, %v822_v12  ;;  %v1343_v41 = vpop.eup %1342  ;;  %v872_v44 = vmul.f32 %v1341_v39, %v1793_v22 }
 0x153   : > { %v856_v48 = vmul.f32 %v1343_v41, %v854_v23  ;;  %vm861_vm6 = vweird.f32 %v1343_v41 }
 0x154   : > { %v824_v42 = vmul.f32 %v1339_v36, %v823_v40  ;;  %v873_v49 = vmul.f32 %v1341_v39, %v872_v44  ;;  %vm862_vm7 = vmor %vm860_vm5, %vm861_vm6 }
 0x155   : > { %v857_v52 = vsub.f32 1.0, %v856_v48 }
 0x156   : > { %v825_v47 = vmul.f32 %v824_v42, %v813_v31  ;;  %v874_v54 = vmul.f32 0.5, %v873_v49  ;;  %v923_v49 = vstv %s909_s26 }
 0x157   : > { %v858_v56 = vmul.f32 %v1343_v41, %v857_v52 }
 0x158   : > { %v827_v26 = vsel %vm826_vm3, %v813_v31, %v825_v47  ;;  %v875_v62 = vsub.f32 1.5, %v874_v54  ;;  %v890_v31 = vadd.f32 %v1777_v19, %v1633_v24  ;;  %v895_v19 = vstv %s1807_s22 }
 0x159   : > { %v830_v50 = vsel %vm828_vm4, %v829_v46, %v827_v26  ;;  %v859_v0 = vadd.f32 %v1343_v41, %v858_v56  ;;  %v921_v26 = vstv %s907_s25  ;;  %s148_s25 = sand.u32 1, %s1467_s10  }
 0x15a   : > { %v832_v51 = vadd.f32 %v831_v2, %v830_v50  ;;  %v876_v1 = vmul.f32 %v1341_v39, %v875_v62  ;;  %v891_v23 = vmul.f32 0.5, %v890_v31  ;;  %s1230_s26 = smul.u32 24, %s148_s25  ;;  %s1124_s13 = scalar_lea.sflag [#allocation4], %s148_s25 }
 0x15b   : > { %v863_v6 = vsel %vm862_vm7, %v1343_v41, %v859_v0 }
 0x15c   : > { %v833_v53 = vmul.f32 0.33333334, %v832_v51  ;;  %v877_v8 = vmul.f32 %v876_v1, %v1793_v22  ;;  %v868_v10 = vsel %vm865_vm8, %v867_v3, %v863_v6 }
 0x15d   : > { %v869_v18 = vmul.f32 0.5, %v868_v10 }
 0x15e   : > { %v834_v55 = vmul.f32 %v833_v53, %v833_v53  ;;  %v879_v14 = vsel %vm878_vm9, %v1793_v22, %v877_v8 }
 0x15f   : > { %v882_v27 = vsel %vm880_vm12, %v881_v43, %v879_v14  ;;  %v886_v36 = vmul.f32 %v885_v28, %v869_v18 }
 0x160   : > { %v835_v61 = vmul.f32 %v834_v55, %v834_v55  ;;  %v883_v22 = vmul.f32 %v882_v27, %v869_v18 }
 0x162   : > { %1344 = vrcp.f32 %v835_v61  ;;  %v848_v30 = vand.u32 2147483648, %v835_v61  ;;  %vm842_vm10 = vweird.f32 %v835_v61  ;;  %v846_v13 = vand.u32 2147483647, %v835_v61 }
 0x164   : > { %v849_v17 = vor.u32 1.1754944e-38, %v848_v30  ;;  %vm847_vm14 = vcmp.eq.f32.partialorder %v846_v13, 8.507059e+37 }
 0x168   : > { %v1345_v7 = vpop.eup %1344 }
 0x169   : > { %v838_v9 = vmul.f32 %v1345_v7, %v835_v61  ;;  %vm843_vm11 = vweird.f32 %v1345_v7 }
 0x16a   : > { %vm844_vm13 = vmor %vm842_vm10, %vm843_vm11 }
 0x16b   : > { %v839_v11 = vsub.f32 1.0, %v838_v9  ;;  %v938_v9 = vstv %s915_s28 }
 0x16d   : > { %v840_v15 = vmul.f32 %v1345_v7, %v839_v11 }
 0x16f   : > { %v841_v59 = vadd.f32 %v1345_v7, %v840_v15 }
 0x171   : > { %v845_v29 = vsel %vm844_vm13, %v1345_v7, %v841_v59 }
 0x172   : > { %v850_v34 = vsel %vm847_vm14, %v849_v17, %v845_v29 }
 0x173   : > { %v1814_v35 = vmul.f32 %v850_v34, %v836_v16 }
 0x175   : > { %vm852_vm1 = vcmp.ge.f32.partialorder %v1814_v35, 0.0001 }
 0x176   : > { %v884_v38 = vsel %vm852_vm1, %v883_v22, 0.0  ;;  %v887_v24 = vsel %vm852_vm1, %v886_v36, 0.0 }
 0x177   : > { %v892_v25 = vmul.f32 %v887_v24, %v1783_v21  ;;  %v894_v20 = vmul.f32 %v884_v38, %v1787_v60  ;;  %v900_v12 = vmul.f32 %v887_v24, %v1787_v60  ;;  %v902_v39 = vmul.f32 %v884_v38, %v1783_v21 }
 0x179   : > { %v893_v40 = vadd.f32 %v892_v25, %v891_v23  ;;  %v896_v41 = vmul.f32 %v895_v19, %v894_v20  ;;  %v901_v42 = vadd.f32 %v900_v12, %v899_v37  ;;  %v903_v44 = vmul.f32 %v902_v39, %v895_v19 }
 0x17b   : > { %v1828_v46 = vsub.f32 %v893_v40, %v896_v41  ;;  %v1830_v47 = vadd.f32 %v903_v44, %v901_v42 }
 0x17d   : > { %v1834_v2 = vsub.f32 %v1828_v46, %v1726_v57  ;;  %v1838_v60 = vsub.f32 %v1830_v47, %v1728_v58 }
 0x17f   : > { %v918_v21 = vmul.f32 %v1834_v2, %v1834_v2  ;;  %v919_v48 = vmul.f32 %v1838_v60, %v1838_v60 }
 0x181   : > { %v920_v50 = vadd.f32 %v919_v48, %v918_v21  ;;  %v992_v48 = vstv %s1853_s3  ;;  %s1892_s3 = scalar_lea.vmem [#allocation7], %s1230_s26 }
 0x183   : > { %v922_v51 = vsub.f32 %v921_v26, %v920_v50  ;;  %v924_v52 = vsub.f32 %v920_v50, %v923_v49  ;;  %1346 = vrsqrt.f32 %v920_v50  ;;  %vm960_vm3 = vcmp.gt.f32.partialorder %v920_v50, 0.0 }
 0x184   : > { %v961_v56 = vsel %vm960_vm3, %v920_v50, 1.0  ;;  %vm933_vm4 = vcmp.eq.f32.partialorder %v920_v50, inf  ;;  %v936_v7 = vand.u32 2147483648, %v920_v50  ;;  %vm935_vm5 = vcmp.eq.f32.partialorder %v920_v50, 0.0 }
 0x185   : > { %v1844_v53 = vmul.f32 %v924_v52, %v922_v51  ;;  %vm967_vm6 = vweird.f32 %v961_v56  ;;  %v973_v28 = vand.u32 2147483648, %v961_v56  ;;  %v971_v31 = vand.u32 2147483647, %v961_v56 }
 0x186   : > { %v997_v49 = vadd.f32 %v1828_v46, %v1726_v57  ;;  %v1002_v46 = vstv %s1862_s6 }
 0x187   : > { %v1847_v54 = vmax.f32 %v1844_v53, 0.0  ;;  %v974_v34 = vor.u32 1.1754944e-38, %v973_v28  ;;  %vm972_vm9 = vcmp.eq.f32.partialorder %v971_v31, 8.507059e+37  ;;  %v943_v40 = vmul.f32 0.25, %v1844_v53 }
 0x189   : > { %v1347_v55 = vpop.eup %1346  ;;  %1348 = vrsqrt.f32 %v1847_v54  ;;  %vm985_vm10 = vcmp.eq.f32.partialorder %v1847_v54, inf  ;;  %v988_v19 = vand.u32 2147483648, %v1847_v54  ;;  %vm987_vm13 = vcmp.eq.f32.partialorder %v1847_v54, 0.0 }
 0x18a   : > { %v927_v61 = vmul.f32 %v1347_v55, %v920_v50  ;;  %1350 = vrcp.f32 %v961_v56 }
 0x18c   : > { %v928_v62 = vmul.f32 %v1347_v55, %v927_v61 }
 0x18e   : > { %v929_v63 = vmul.f32 0.5, %v928_v62 }
 0x18f   : > { %v1349_v0 = vpop.eup %1348 }
 0x190   : > { %v930_v5 = vsub.f32 1.5, %v929_v63  ;;  %v1351_v1 = vpop.eup %1350  ;;  %v979_v6 = vmul.f32 %v1349_v0, %v1847_v54 }
 0x191   : > { %v963_v30 = vmul.f32 %v1351_v1, %v961_v56  ;;  %vm968_vm7 = vweird.f32 %v1351_v1 }
 0x192   : > { %v931_v3 = vmul.f32 %v1347_v55, %v930_v5  ;;  %v980_v43 = vmul.f32 %v1349_v0, %v979_v6  ;;  %vm969_vm8 = vmor %vm967_vm6, %vm968_vm7  ;;  %v998_v55 = vmul.f32 0.5, %v997_v49  ;;  %v1013_v6 = vstv %s1867_s8  ;;  %s1136_s8 = sshll.u32 %s1892_s3, 4  ;;  %s1137_s8 = int_to_ptr.vmem [resolvable:$true] %s1136_s8 }
 0x193   : > { %v964_v14 = vsub.f32 1.0, %v963_v30 }
 0x194   : > { %v932_v8 = vmul.f32 %v931_v3, %v920_v50  ;;  %v981_v16 = vmul.f32 0.5, %v980_v43 }
 0x195   : > { %v965_v18 = vmul.f32 %v1351_v1, %v964_v14 }
 0x196   : > { %v934_v10 = vsel %vm933_vm4, %v920_v50, %v932_v8  ;;  %v982_v27 = vsub.f32 1.5, %v981_v16  ;;  %v1005_v50 = vadd.f32 %v1830_v47, %v1728_v58 }
 0x197   : > { %v937_v11 = vsel %vm935_vm5, %v936_v7, %v934_v10  ;;  %v966_v29 = vadd.f32 %v1351_v1, %v965_v18  ;;  %v1015_v7 = vstv %s156_s14 }
 0x198   : > { %v939_v13 = vadd.f32 %v938_v9, %v937_v11  ;;  %v983_v33 = vmul.f32 %v1349_v0, %v982_v27  ;;  %v1006_v56 = vmul.f32 0.5, %v1005_v50 }
 0x199   : > { %v970_v22 = vsel %vm969_vm8, %v1351_v1, %v966_v29 }
 0x19a   : > { %v940_v15 = vmul.f32 0.33333334, %v939_v13  ;;  %v984_v23 = vmul.f32 %v983_v33, %v1847_v54  ;;  %v975_v24 = vsel %vm972_vm9, %v974_v34, %v970_v22 }
 0x19b   : > { %v976_v42 = vmul.f32 0.5, %v975_v24 }
 0x19c   : > { %v941_v17 = vmul.f32 %v940_v15, %v940_v15  ;;  %v986_v12 = vsel %vm985_vm10, %v1847_v54, %v984_v23 }
 0x19d   : > { %v989_v21 = vsel %vm987_vm13, %v988_v19, %v986_v12  ;;  %v993_v53 = vmul.f32 %v992_v48, %v976_v42 }
 0x19e   : > { %v942_v59 = vmul.f32 %v941_v17, %v941_v17  ;;  %v990_v52 = vmul.f32 %v989_v21, %v976_v42 }
 0x1a0   : > { %1352 = vrcp.f32 %v942_v59  ;;  %v955_v38 = vand.u32 2147483648, %v942_v59  ;;  %vm949_vm11 = vweird.f32 %v942_v59  ;;  %v953_v20 = vand.u32 2147483647, %v942_v59 }
 0x1a2   : > { %v956_v41 = vor.u32 1.1754944e-38, %v955_v38  ;;  %vm954_vm3 = vcmp.eq.f32.partialorder %v953_v20, 8.507059e+37 }
 0x1a6   : > { %v1353_v36 = vpop.eup %1352 }
 0x1a7   : > { %v945_v37 = vmul.f32 %v1353_v36, %v942_v59  ;;  %vm950_vm12 = vweird.f32 %v1353_v36 }
 0x1a8   : > { %vm951_vm14 = vmor %vm949_vm11, %vm950_vm12 }
 0x1a9   : > { %v946_v25 = vsub.f32 1.0, %v945_v37 }
 0x1ab   : > { %v947_v39 = vmul.f32 %v1353_v36, %v946_v25 }
 0x1ad   : > { %v948_v44 = vadd.f32 %v1353_v36, %v947_v39 }
 0x1af   : > { %v952_v26 = vsel %vm951_vm14, %v1353_v36, %v948_v44 }
 0x1b0   : > { %v957_v51 = vsel %vm954_vm3, %v956_v41, %v952_v26 }
 0x1b1   : > { %v1873_v54 = vmul.f32 %v957_v51, %v943_v40 }
 0x1b3   : > { %vm959_vm4 = vcmp.ge.f32.partialorder %v1873_v54, 0.0001 }
 0x1b4   : > { %v991_v61 = vsel %vm959_vm4, %v990_v52, 0.0  ;;  %v994_v57 = vsel %vm959_vm4, %v993_v53, 0.0 }
 0x1b5   : > { %v999_v58 = vmul.f32 %v994_v57, %v1834_v2  ;;  %v1001_v47 = vmul.f32 %v991_v61, %v1838_v60  ;;  %v1007_v62 = vmul.f32 %v994_v57, %v1838_v60  ;;  %v1009_v63 = vmul.f32 %v991_v61, %v1834_v2 }
 0x1b6   : > { %v1486_v60 = vmov 1024.0  }
 0x1b7   : > { %v1000_v0 = vadd.f32 %v999_v58, %v998_v55  ;;  %v1003_v5 = vmul.f32 %v1002_v46, %v1001_v47  ;;  %v1008_v1 = vadd.f32 %v1007_v62, %v1006_v56  ;;  %v1010_v3 = vmul.f32 %v1009_v63, %v1002_v46 }
 0x1b8   : > { %1354 = vrcp.f32 %v1486_v60 }
 0x1b9   : > { %v1004_v8 = vsub.f32 %v1000_v0, %v1003_v5  ;;  %v1011_v9 = vadd.f32 %v1010_v3, %v1008_v1 }
 0x1bb   : > { %v1014_v30 = vmul.f32 %v1013_v6, %v1004_v8  ;;  %v1016_v10 = vmul.f32 %v1015_v7, %v1011_v9  ;;  %v1018_v43 = vsub.f32 0.0, %v1004_v8  ;;  %v1020_v14 = vmul.f32 %v1013_v6, %v1011_v9 }
 0x1bd   : > { %v1017_v11 = vadd.f32 %v1016_v10, %v1014_v30  ;;  %v1019_v13 = vmul.f32 %v1018_v43, %v1015_v7 }
 0x1be   : > { %v1355_v2 = vpop.eup %1354 }
 0x1bf   : > { %1022 = vadd.xlane.f32.xlu0 %v1017_v11  ;;  %v1021_v15 = vadd.f32 %v1020_v14, %v1019_v13  ;;  %v1032_v16 = vmul.f32 1024.0, %v1355_v2  ;;  %vm1036_vm5 = vweird.f32 %v1355_v2  ;;  %v569_v14 = vsub.f32 0.0001, %v1675_v32 }
 0x1c1   : > { %v1033_v17 = vsub.f32 1.0, %v1032_v16  ;;  %v570_v60 = vsel %vm533_vm2, 0.0, %v569_v14  ;;  %v781_v16 = vsub.f32 0.0001, %v1763_v4 }
 0x1c3   : > { %v1034_v28 = vmul.f32 %v1355_v2, %v1033_v17 }
 0x1c5   : > { %v1035_v33 = vadd.f32 %v1355_v2, %v1034_v28 }
 0x1c7   : > { %1042 = vadd.xlane.f32.xlu0 %v1021_v15  ;;  %v1037_v38 = vsel %vm1036_vm5, %v1355_v2, %v1035_v33 }
 0x232   : > { %v1023_v18 = vpop.xlane.xlu0 %1022 }
 0x233   : > { %v1024_v59 = vrot.slane %v1023_v18, 4 }
 0x235   : > { %v1025_v27 = vadd.f32 %v1024_v59, %v1023_v18  ;;  %v782_v18 = vsel %vm745_vm15, 0.0, %v781_v16  ;;  %v888_v59 = vsub.f32 0.0001, %v1814_v35 }
 0x237   : > { %v1026_v29 = vrot.slane %v1025_v27, 2  ;;  %v889_v28 = vsel %vm852_vm1, 0.0, %v888_v59 }
 0x239   : > { %v1027_v31 = vadd.f32 %v1026_v29, %v1025_v27  ;;  %v995_v29 = vsub.f32 0.0001, %v1873_v54 }
 0x23a   : > { %v1043_v34 = vpop.xlane.xlu0 %1042 }
 0x23b   : > { %v1044_v22 = vrot.slane %v1043_v34, 4  ;;  %v1028_v36 = vrot.slane %v1027_v31, 1 }
 0x23d   : > { %v1045_v23 = vadd.f32 %v1044_v22, %v1043_v34  ;;  %v1029_v37 = vadd.f32 %v1028_v36, %v1027_v31 }
 0x23f   : > { %v1046_v24 = vrot.slane %v1045_v23, 2  ;;  %1231 = vpush %v1029_v37 }
 0x240   : > { %1233 = vpush %v1037_v38 }
 0x241   : > { %v1047_v19 = vadd.f32 %v1046_v24, %v1045_v23 }
 0x243   : > { %v1048_v25 = vrot.slane %v1047_v19, 1 }
 0x245   : > { %v1049_v20 = vadd.f32 %v1048_v25, %v1047_v19 }
 0x247   : > { %1235 = vpush %v1049_v20 }
 0x270   : > { %s1232_s30 = spop %1231 }
 0x271   : > { %s1234_s16 = spop %1233 }
 0x272   : > { %s1039_s17 = smul.f32 %s1234_s16, %s1232_s30  ;;  %s1138_s30 = sshll.u32 %s1135_s7, 4  ;;  %s1139_s30 = int_to_ptr.hbm [resolvable:$true] %s1138_s30 }
 0x274   : > { %v1040_v12 = vstv %s1039_s17 }
 0x275   : > { %v1041_v39 = vsub.f32 %v1017_v11, %v1040_v12 }
 0x277   : > { %v1062_v42 = vmul.f32 %v1041_v39, %v1041_v39 }
 0x278   : > { %s1236_s21 = spop %1235 }
 0x279   : > { %s1059_s22 = smul.f32 %s1236_s21, %s1234_s16 }
 0x27b   : > { %v1060_v40 = vstv %s1059_s22 }
 0x27c   : > { %v1061_v41 = vsub.f32 %v1021_v15, %v1060_v40  ;;  %v674_v15 = vsub.f32 0.0001, %v1710_v45  ;;  %v996_v45 = vsel %vm959_vm4, 0.0, %v995_v29 }
 0x27e   : > { %v1063_v44 = vmul.f32 %v1061_v41, %v1061_v41  ;;  %v675_v2 = vsel %vm638_vm0, 0.0, %v674_v15 }
 0x27f   : > { %v691_v17 = vadd.f32 %v675_v2, %v570_v60 }
 0x280   : > { %v1064_v21 = vadd.f32 %v1063_v44, %v1062_v42 }
 0x281   : > { %v798_v27 = vadd.f32 %v782_v18, %v691_v17 }
 0x282   : > { %1065 = vadd.xlane.f32.xlu1 %v1064_v21 }
 0x283   : > { %v905_v32 = vadd.f32 %v889_v28, %v798_v27 }
 0x285   : > { %v1012_v4 = vadd.f32 %v996_v45, %v905_v32 }
 0x2f5   : > { %v1066_v48 = vpop.xlane.xlu1 %1065 }
 0x2f6   : > { %v1067_v26 = vrot.slane %v1066_v48, 4 }
 0x2f8   : > { %v1068_v49 = vadd.f32 %v1067_v26, %v1066_v48 }
 0x2fa   : > { %v1069_v50 = vrot.slane %v1068_v49, 2 }
 0x2fc   : > { %v1070_v51 = vadd.f32 %v1069_v50, %v1068_v49 }
 0x2fe   : > { %v1071_v52 = vrot.slane %v1070_v51, 1 }
 0x300   : > { %v1072_v53 = vadd.f32 %v1071_v52, %v1070_v51 }
 0x302   : > { %1237 = vpush %v1072_v53 }
 0x333   : > { %s1238_s23 = spop %1237 }
 0x334   : > { %s1082_s24 = smul.f32 %s1238_s23, %s1234_s16  ;;  %s1419_s16 = sshra.s32 %s1139_s30, 4  ;;  %s1420_s16 = int_to_ptr.hbm [resolvable:$true] %s1419_s16 }
 0x335   : > { %s1421_s17 = scalar_lea.hbm %s1420_s16, 24  ;;  %s1425_s23 = scalar_lea.hbm %s1949_s2, 96 }
 0x336   : > { %v1083_v55 = vstv %s1082_s24  ;;  %p1422_p0 = scmp.ne.s32.totalorder %s1420_s16, %s1421_s17  ;;  %p1426_p3 = scmp.lt.s32.totalorder %s1420_s16, %s1949_s2 }
 0x337   : > { %1356 = vrsqrt.f32 %v1083_v55  ;;  %vm1090_vm7 = vweird.f32 %v1083_v55  ;;  %p1427_p4 = scmp.lt.s32.totalorder %s1425_s23, %s1421_s17 }
 0x338   : > { %p1423_p1 = pnand %p1422_p0, %p1542_p5 }
 0x339   : > { %p1428_p7 = por %p1427_p4, %p1426_p3 }
 0x33a   : > { %p1424_p2 = pneg %p1423_p1 }
 0x33c   : > { %p1429_p8 = pnand %p1428_p7, %p1424_p2 }
 0x33d   : > { %v1357_v56 = vpop.eup %1356 }
 0x33e   : > { %v1085_v61 = vmul.f32 %v1357_v56, %v1083_v55  ;;  %vm1091_vm6 = vweird.f32 %v1357_v56 }
 0x33f   : > { %vm1092_vm8 = vmor %vm1090_vm7, %vm1091_vm6 }
 0x340   : > { %v1086_v57 = vmul.f32 %v1357_v56, %v1085_v61 }
 0x342   : > { %v1087_v46 = vmul.f32 0.5, %v1086_v57 }
 0x344   : > { %v1088_v58 = vsub.f32 1.5, %v1087_v46 }
 0x346   : > { %v1089_v47 = vmul.f32 %v1357_v56, %v1088_v58 }
 0x348   : > { %v1093_v62 = vsel %vm1092_vm8, %v1357_v56, %v1089_v47 }
 0x349   : > { %1239 = vpush %v1093_v62 }
 0x37a   : > { %s1240_s27 = spop %1239 }
 0x37b   : > { %s1889_s28 = smul.f32 %s1240_s27, %s1082_s24  ;;  %v1115_v63 = vstv %s1240_s27 }
 0x37c   : > { %v1116_v0 = vmul.f32 %v1115_v63, %v1041_v39  ;;  %v1118_v5 = vmul.f32 %v1115_v63, %v1061_v41 }
 0x37d   : > { %s1097_s29 = sadd.f32 0.01, %s1889_s28  ;;  %p1096_p13 = scmp.lt.f32.partialorder %s1889_s28, 0.1 }
 0x37e   : > { %1117 = vst [vmem:[%s1892_s3] sm:$0xff] %v1116_v0 }
 0x37f   : > { %v1098_v1 = vstv %s1097_s29  ;;  %1119 = vst [vmem:[%s1892_s3 + $0x8] sm:$0xff] %v1118_v5 }
 0x380   : > { %1358 = vrcp.f32 %v1098_v1  ;;  %v1110_v8 = vand.u32 2147483648, %v1098_v1  ;;  %v1108_v30 = vand.u32 2147483647, %v1098_v1  ;;  %vm1104_vm10 = vweird.f32 %v1098_v1 }
 0x382   : > { %v1111_v43 = vor.u32 1.1754944e-38, %v1110_v8  ;;  %vm1109_vm12 = vcmp.eq.f32.partialorder %v1108_v30, 8.507059e+37 }
 0x386   : > { %v1359_v3 = vpop.eup %1358 }
 0x387   : > { %v1100_v6 = vmul.f32 %v1359_v3, %v1098_v1  ;;  %vm1105_vm9 = vweird.f32 %v1359_v3 }
 0x388   : > { %vm1106_vm11 = vmor %vm1104_vm10, %vm1105_vm9 }
 0x389   : > { %v1101_v7 = vsub.f32 1.0, %v1100_v6 }
 0x38b   : > { %v1102_v9 = vmul.f32 %v1359_v3, %v1101_v7 }
 0x38d   : > { %v1103_v10 = vadd.f32 %v1359_v3, %v1102_v9 }
 0x38f   : > { %v1107_v11 = vsel %vm1106_vm11, %v1359_v3, %v1103_v10 }
 0x390   : > { %v1112_v13 = vsel %vm1109_vm12, %v1111_v43, %v1107_v11 }
 0x391   : > { %1241 = vpush %v1112_v13 }
 0x3c2   : > { %s1242_s14 = spop %1241 }
 0x3c3   : > { %s1957_s14 = smov (!%p1096_p13, %s1242_s14), 0.0 }
 0x3c4   : > { %v1120_v35 = vstv %s1957_s14 }
 0x3c5   : > { %v1121_v31 = vadd.f32 %v1120_v35, %v1012_v4 }
 0x3c7   : > { %1122 = vst [vmem:[%s1892_s3 + $0x10] sm:$0xff] %v1121_v31 }
 0x3c8   : > { %1432 = shalt.err (!%p1429_p8)
}
 0x3c9   : > { %s1487_s25 = smov 128   ;;  %s1488_s27 = smov 8  }
 0x3ca   : > { %1252 = dma.vmem_to_hbm [thread:$0]  (%p1542_p5), %s1137_s8, 384, %s1139_s30, %s1124_s13, %s1487_s25, %s1487_s25, %s1488_s27  }
 0x3cb PF: > { %p1269_p9 = scmp.ge.s32.totalorder %s1475_s12, 2  ;;  %s1153_s28 = sand.u32 1, %s1463_s9  }
 0x3cc   : > { %s1154_s29 = scalar_lea.sflag [#allocation4], %s1153_s28 }
 0x3cd   : > { %p1262_p10 = pnand %p1269_p9, %p1546_p6 }
 0x3cf   : > { %p1263_p11 = pneg %p1262_p10 }
 0x3d1   : > { %1458 = dma.done.wait (%p1263_p11), %s1154_s29, 384  }
 0x3d2   : > { %1460 = vsyncadd (%p1263_p11), %s1154_s29, 4294966912  ;;  %p14_p12 = scmp.ge.s32.totalorder %s1529_s15, 6   ;;  %s1952_s9 = smov %s1467_s10 }
 0x3d3   : > { %s1953_s10 = smov %s1471_s11  ;;  %s1954_s11 = smov %s1540_s18 }
 0x3d4   : > { %s1955_s12 = smov %s1529_s15  ;;  %16 = sbr.rel (!%p14_p12) target bundleno = 5 (0x5), region = 70 }
 0x3d9   :  { %1160 = vsyncpa [#allocation3], 1 }
 0x3da   :  { %1162 = vsyncpa [#allocation3 + $0x1], 1 }
 0x3db   :  { %1163 = vsyncpa [#allocation4], 1 }
 0x3dc   :  { %1165 = vsyncpa [#allocation4 + $0x1], 1 }
 0x3dd   :  { %1166 = vsyncpa [#allocation5], 1 }
 0x3de   :  { %1168 = vsyncpa [#allocation5 + $0x1], 1 }

</bundles_post_ra>
